<compile_context>
chip_gen: v6e
topology: v6e:2x2x1
jax: 0.10.0
libtpu: 0.0.40
codegen_flags: <defaults>
</compile_context>

<pallas_src>
import functools
import math

import jax
import jax.numpy as jnp
from jax.experimental import pallas as pl
from jax.experimental.pallas import tpu as pltpu


def _mha_kernel(*refs, num_heads, has_mask):
    if has_mask:
        (xq_ref, xk_ref, xv_ref,
         wq_ref, bq_ref, wk_ref, bk_ref, wv_ref, bv_ref, wo_ref, bo_ref,
         bias_ref, o_ref, q_sc, k_sc, v_sc) = refs
    else:
        (xq_ref, xk_ref, xv_ref,
         wq_ref, bq_ref, wk_ref, bk_ref, wv_ref, bv_ref, wo_ref, bo_ref,
         o_ref, q_sc, k_sc, v_sc) = refs
        bias_ref = None

    S = xq_ref.shape[1]
    D = xq_ref.shape[2]

    # One batch element per grid step: (S, D) slabs in their native dtype.
    xq = xq_ref[0]
    xk = xk_ref[0]
    xv = xv_ref[0]

    # Q/K/V projections, one head at a time: weights are sliced on the leading
    # (head) axis (cheap, no lane-granularity slicing), results land in
    # (H, S, d_k) VMEM scratches with heads as the leading batch dim.
    # The 1/sqrt(d_k) scale is already folded into wq/bq by the wrapper.
    for h in range(num_heads):
        q_sc[h] = (jnp.dot(xq, wq_ref[h], preferred_element_type=jnp.float32)
                   + bq_ref[h].astype(jnp.float32)).astype(q_sc.dtype)
        k_sc[h] = (jnp.dot(xk, wk_ref[h], preferred_element_type=jnp.float32)
                   + bk_ref[h].astype(jnp.float32)).astype(k_sc.dtype)
        v_sc[h] = (jnp.dot(xv, wv_ref[h], preferred_element_type=jnp.float32)
                   + bv_ref[h].astype(jnp.float32)).astype(v_sc.dtype)

    # scores = q @ k^T, batched over heads (single MXU-friendly einsum instead
    # of num_heads tiny 2-D matmuls).
    s = jnp.einsum("hqd,hkd->hqk", q_sc[...], k_sc[...],
                   preferred_element_type=jnp.float32)         # (H, S, S) f32

    if bias_ref is not None:
        # Additive mask bias (0 / -1e9), shared across heads: one add/elem.
        s = s + bias_ref[...].astype(jnp.float32)

    # Numerically-stable softmax; divide via EUP reciprocal + 1 Newton step.
    s_max = jnp.max(s, axis=-1, keepdims=True)
    p = jnp.exp(s - s_max)
    denom = jnp.sum(p, axis=-1, keepdims=True)
    r = pl.reciprocal(denom, approx=True)
    r = r * (2.0 - denom * r)          # Newton refinement -> ~f32 accuracy
    p = p * r

    # TODO(synk): training-mode dropout on `p` would go here (eval => no-op).

    # Context = p @ v, batched over heads; p cast to V's dtype for the MXU.
    ctx = jnp.einsum("hqk,hkd->hqd", p.astype(v_sc.dtype), v_sc[...],
                     preferred_element_type=jnp.float32)       # (H, S, d_k)

    # Output projection: accumulate each head's contribution into an f32
    # accumulator (replaces concatenate + one big matmul; same FLOPs, no
    # lane-shuffle work, lower vreg pressure).
    acc = jnp.zeros((S, D), jnp.float32)
    for h in range(num_heads):
        acc = acc + jnp.dot(ctx[h].astype(v_sc.dtype), wo_ref[h],
                            preferred_element_type=jnp.float32)
    out = acc + bo_ref[...].astype(jnp.float32)
    o_ref[0] = out.astype(o_ref.dtype)


def multi_head_attention(xq, xk, xv,
                         wq, bq, wk, bk, wv, bv, wo, bo,
                         *, num_heads, mask=None):
    """Pallas TPU forward of the PyTorch MultiHeadAttention module.

    xq, xk, xv : (batch, seq, d_model)
    w* : (d_model, d_model) PyTorch-layout Linear weights (out, in)
    b* : (d_model,)
    mask : optional (batch, seq_q, seq_k) bool/int/0-1 float; positions where
           mask == 0 are suppressed (masked_fill(-1e9) semantics).
    """
    B, S, D = xq.shape
    assert D % num_heads == 0, "d_model must be divisible by num_heads"
    d_k = D // num_heads
    scale = 1.0 / math.sqrt(d_k)
    dtype = xq.dtype

    # --- one-time weight re-layout in the wrapper (no in-kernel transposes) --
    #  * Q/K/V: (H, D, d_k), PyTorch y = x @ W.T + b, out features head-major.
    #  * 1/sqrt(d_k) folded into the Q weights/bias.
    #  * O: (H, d_k, D) so each head's slice multiplies directly.
    def per_head_in(w, b, s=1.0):
        wt = (w.T * s).reshape(D, num_heads, d_k).transpose(1, 0, 2)
        bb = (b * s).reshape(num_heads, 1, d_k)
        return wt.astype(dtype), bb.astype(dtype)

    wq_h, bq_h = per_head_in(wq, bq, scale)
    wk_h, bk_h = per_head_in(wk, bk)
    wv_h, bv_h = per_head_in(wv, bv)
    wo_h = wo.T.reshape(num_heads, d_k, D).astype(dtype)
    bo_r = bo.reshape(1, D).astype(dtype)

    kernel = functools.partial(_mha_kernel, num_heads=num_heads,
                               has_mask=mask is not None)

    x_spec = pl.BlockSpec((1, S, D), lambda b: (b, 0, 0))
    w_spec = pl.BlockSpec((num_heads, D, d_k), lambda b: (0, 0, 0))
    b_spec = pl.BlockSpec((num_heads, 1, d_k), lambda b: (0, 0, 0))
    wo_spec = pl.BlockSpec((num_heads, d_k, D), lambda b: (0, 0, 0))
    bo_spec = pl.BlockSpec((1, D), lambda b: (0, 0))
    # NOTE: at production D, add pipeline_mode=pl.Buffered(1) to the constant
    # weight/bias specs to halve their resident VMEM (esp. on v7x's 64 MiB).

    in_specs = [x_spec, x_spec, x_spec,
                w_spec, b_spec, w_spec, b_spec, w_spec, b_spec,
                wo_spec, bo_spec]
    args = [xq, xk, xv, wq_h, bq_h, wk_h, bk_h, wv_h, bv_h, wo_h, bo_r]

    if mask is not None:
        # Precompute an additive bias: 0 where kept, -1e9 where masked.
        # (Note: a fully-masked row differs from masked_fill's uniform softmax
        #  — acceptable per spec, and not exercised here.)
        attn_bias = jnp.where(mask == 0, jnp.float32(-1e9),
                              jnp.float32(0.0)).astype(dtype)
        in_specs.append(pl.BlockSpec((1, S, S), lambda b: (b, 0, 0)))
        args.append(attn_bias)

    scratch_shapes = [
        pltpu.VMEM((num_heads, S, d_k), dtype),   # q per head
        pltpu.VMEM((num_heads, S, d_k), dtype),   # k per head
        pltpu.VMEM((num_heads, S, d_k), dtype),   # v per head
    ]

    # VMEM budget: double-buffered activation slabs + weights + mask bias +
    # per-head scratches + f32 score intermediates, with generous headroom.
    isz = xq.dtype.itemsize
    est = (2 * 3 * S * D * isz            # q/k/v slabs (double-buffered)
           + 2 * S * D * isz              # output slab
           + 2 * 4 * D * D * isz          # projection weights
           + 2 * 4 * D * isz              # biases
           + (2 * S * S * isz if mask is not None else 0)
           + 3 * num_heads * S * d_k * isz
           + 3 * num_heads * S * S * 4)   # f32 scores / probs / exp temp
    vmem_limit = int(min(max(4 * est, 8 << 20), 96 << 20))

    return pl.pallas_call(
        kernel,
        out_shape=jax.ShapeDtypeStruct((B, S, D), dtype),
        grid=(B,),
        in_specs=in_specs,
        out_specs=pl.BlockSpec((1, S, D), lambda b: (b, 0, 0)),
        scratch_shapes=scratch_shapes,
        compiler_params=pltpu.CompilerParams(
            dimension_semantics=("parallel",),
            vmem_limit_bytes=vmem_limit),
    )(*args)


def _reference(xq, xk, xv, wq, bq, wk, bk, wv, bv, wo, bo,
               *, num_heads, mask=None):
    """Pure-JAX mirror of the PyTorch forward (dropout = identity)."""
    B, S, D = xq.shape
    d_k = D // num_heads

    def proj(x, w, b):
        return x @ w.T + b

    def heads(x):
        return x.reshape(B, S, num_heads, d_k).transpose(0, 2, 1, 3)

    q = heads(proj(xq, wq, bq))
    k = heads(proj(xk, wk, bk))
    v = heads(proj(xv, wv, bv))
    scores = jnp.einsum("bhqd,bhkd->bhqk", q, k) / math.sqrt(d_k)
    if mask is not None:
        scores = jnp.where(mask[:, None, :, :] == 0, -1e9, scores)
    attn = jax.nn.softmax(scores, axis=-1)
    out = jnp.einsum("bhqk,bhkd->bhqd", attn, v)
    out = out.transpose(0, 2, 1, 3).reshape(B, S, D)
    return out @ wo.T + bo


if __name__ == "__main__":
    batch, seq, d_model, num_heads = 2, 8, 32, 4
    key = jax.random.PRNGKey(0)
    keys = jax.random.split(key, 12)

    xq = jax.random.normal(keys[0], (batch, seq, d_model), dtype=jnp.float32)
    xk = jax.random.normal(keys[1], (batch, seq, d_model), dtype=jnp.float32)
    xv = jax.random.normal(keys[2], (batch, seq, d_model), dtype=jnp.float32)

    def init_linear(kw, kb):
        # deterministic nn.Linear-style init (uniform in +/- 1/sqrt(fan_in))
        bound = 1.0 / math.sqrt(d_model)
        w = jax.random.uniform(kw, (d_model, d_model), jnp.float32, -bound, bound)
        b = jax.random.uniform(kb, (d_model,), jnp.float32, -bound, bound)
        return w, b

    wq, bq = init_linear(keys[3], keys[4])
    wk, bk = init_linear(keys[5], keys[6])
    wv, bv = init_linear(keys[7], keys[8])
    wo, bo = init_linear(keys[9], keys[10])

    # Tolerances are loosened vs. an f32 reference because the kernel (per the
    # perf guidance) keeps MXU operands in the input dtype / default matmul
    # precision and uses the approx-EUP reciprocal (+ Newton) for softmax.
    ATOL = RTOL = 2e-2

    # --- no-mask path ---
    out = multi_head_attention(xq, xk, xv, wq, bq, wk, bk, wv, bv, wo, bo,
                               num_heads=num_heads)
    out = jax.block_until_ready(out)
    ref = _reference(xq, xk, xv, wq, bq, wk, bk, wv, bv, wo, bo,
                     num_heads=num_heads)
    assert out.shape == (batch, seq, d_model)
    assert jnp.allclose(out, ref, atol=ATOL, rtol=RTOL), "mismatch (no mask)"

    # --- masked path (causal mask, integer 0/1) ---
    causal = jnp.tril(jnp.ones((seq, seq), dtype=jnp.int32))
    mask = jnp.broadcast_to(causal, (batch, seq, seq))
    out_m = multi_head_attention(xq, xk, xv, wq, bq, wk, bk, wv, bv, wo, bo,
                                 num_heads=num_heads, mask=mask)
    out_m = jax.block_until_ready(out_m)
    ref_m = _reference(xq, xk, xv, wq, bq, wk, bk, wv, bv, wo, bo,
                       num_heads=num_heads, mask=mask)
    assert jnp.allclose(out_m, ref_m, atol=ATOL, rtol=RTOL), "mismatch (mask)"

    # --- bf16 activations (production dtype path; MXU runs bf16 operands) ---
    out_bf16 = multi_head_attention(
        xq.astype(jnp.bfloat16), xk.astype(jnp.bfloat16), xv.astype(jnp.bfloat16),
        wq, bq, wk, bk, wv, bv, wo, bo, num_heads=num_heads)
    out_bf16 = jax.block_until_ready(out_bf16)
    assert out_bf16.dtype == jnp.bfloat16
    assert jnp.allclose(out_bf16.astype(jnp.float32), ref,
                        atol=1e-1, rtol=1e-1), "mismatch (bf16)"

    print("KERNEL_OK")
</pallas_src>

<mosaic_0001>
module attributes {stable_mosaic.version = 11 : i64} {
  func.func @_mha_kernel(%arg0: i32, %arg1: memref<1x8x32xf32, #tpu.memory_space<vmem>>, %arg2: memref<1x8x32xf32, #tpu.memory_space<vmem>>, %arg3: memref<1x8x32xf32, #tpu.memory_space<vmem>>, %arg4: memref<4x32x8xf32, #tpu.memory_space<vmem>>, %arg5: memref<4x1x8xf32, #tpu.memory_space<vmem>>, %arg6: memref<4x32x8xf32, #tpu.memory_space<vmem>>, %arg7: memref<4x1x8xf32, #tpu.memory_space<vmem>>, %arg8: memref<4x32x8xf32, #tpu.memory_space<vmem>>, %arg9: memref<4x1x8xf32, #tpu.memory_space<vmem>>, %arg10: memref<4x8x32xf32, #tpu.memory_space<vmem>>, %arg11: memref<1x32xf32, #tpu.memory_space<vmem>>, %arg12: memref<1x8x32xf32, #tpu.memory_space<vmem>>, %arg13: memref<4x8x8xf32, #tpu.memory_space<vmem>>, %arg14: memref<4x8x8xf32, #tpu.memory_space<vmem>>, %arg15: memref<4x8x8xf32, #tpu.memory_space<vmem>>) attributes {dimension_semantics = [#tpu.dimension_semantics<parallel>], iteration_bounds = array<i64: 2>, scalar_prefetch = 0 : i64, scratch_operands = 3 : i64, tpu.core_type = #tpu.core_type<tc>, window_params = [{transform_indices = @transform_0, window_bounds = array<i64: 1, 8, 32>}, {transform_indices = @transform_1, window_bounds = array<i64: 1, 8, 32>}, {transform_indices = @transform_2, window_bounds = array<i64: 1, 8, 32>}, {pipeline_mode = #tpu.pipeline_mode<synchronous>, transform_indices = @transform_3, window_bounds = array<i64: 4, 32, 8>}, {pipeline_mode = #tpu.pipeline_mode<synchronous>, transform_indices = @transform_4, window_bounds = array<i64: 4, 1, 8>}, {pipeline_mode = #tpu.pipeline_mode<synchronous>, transform_indices = @transform_5, window_bounds = array<i64: 4, 32, 8>}, {pipeline_mode = #tpu.pipeline_mode<synchronous>, transform_indices = @transform_6, window_bounds = array<i64: 4, 1, 8>}, {pipeline_mode = #tpu.pipeline_mode<synchronous>, transform_indices = @transform_7, window_bounds = array<i64: 4, 32, 8>}, {pipeline_mode = #tpu.pipeline_mode<synchronous>, transform_indices = @transform_8, window_bounds = array<i64: 4, 1, 8>}, {pipeline_mode = #tpu.pipeline_mode<synchronous>, transform_indices = @transform_9, window_bounds = array<i64: 4, 8, 32>}, {pipeline_mode = #tpu.pipeline_mode<synchronous>, transform_indices = @transform_10, window_bounds = array<i64: 1, 32>}, {transform_indices = @transform_11, window_bounds = array<i64: 1, 8, 32>}]} {
    %c0 = arith.constant 0 : index
    %c0_0 = arith.constant 0 : index
    %c0_1 = arith.constant 0 : index
    %0 = vector.load %arg1[%c0, %c0_0, %c0_1] : memref<1x8x32xf32, #tpu.memory_space<vmem>>, vector<1x8x32xf32>
    %1 = vector.shape_cast %0 : vector<1x8x32xf32> to vector<8x32xf32>
    %c0_2 = arith.constant 0 : index
    %c0_3 = arith.constant 0 : index
    %c0_4 = arith.constant 0 : index
    %2 = vector.load %arg2[%c0_2, %c0_3, %c0_4] : memref<1x8x32xf32, #tpu.memory_space<vmem>>, vector<1x8x32xf32>
    %3 = vector.shape_cast %2 : vector<1x8x32xf32> to vector<8x32xf32>
    %c0_5 = arith.constant 0 : index
    %c0_6 = arith.constant 0 : index
    %c0_7 = arith.constant 0 : index
    %4 = vector.load %arg3[%c0_5, %c0_6, %c0_7] : memref<1x8x32xf32, #tpu.memory_space<vmem>>, vector<1x8x32xf32>
    %5 = vector.shape_cast %4 : vector<1x8x32xf32> to vector<8x32xf32>
    %c0_8 = arith.constant 0 : index
    %c0_9 = arith.constant 0 : index
    %c0_10 = arith.constant 0 : index
    %6 = vector.load %arg4[%c0_8, %c0_9, %c0_10] : memref<4x32x8xf32, #tpu.memory_space<vmem>>, vector<1x32x8xf32>
    %7 = vector.shape_cast %6 : vector<1x32x8xf32> to vector<32x8xf32>
    %cst = arith.constant dense<0.000000e+00> : vector<8x8xf32>
    %8 = tpu.matmul %1, %7, %cst {dimension_numbers = #tpu.dot_dimension_numbers<[1], [0], [0], [1], [0, 0, 1, 1], [], []>} : vector<8x32xf32>, vector<32x8xf32>, vector<8x8xf32> -> vector<8x8xf32>
    %c0_11 = arith.constant 0 : index
    %c0_12 = arith.constant 0 : index
    %c0_13 = arith.constant 0 : index
    %9 = vector.load %arg5[%c0_11, %c0_12, %c0_13] : memref<4x1x8xf32, #tpu.memory_space<vmem>>, vector<1x1x8xf32>
    %10 = vector.shape_cast %9 : vector<1x1x8xf32> to vector<1x8xf32>
    %11 = vector.broadcast %10 : vector<1x8xf32> to vector<8x8xf32>
    %12 = arith.addf %8, %11 : vector<8x8xf32>
    %c0_14 = arith.constant 0 : index
    %c0_15 = arith.constant 0 : index
    %c0_16 = arith.constant 0 : index
    %13 = vector.load %arg13[%c0_14, %c0_15, %c0_16] : memref<4x8x8xf32, #tpu.memory_space<vmem>>, vector<1x8x8xf32>
    %14 = vector.shape_cast %13 : vector<1x8x8xf32> to vector<8x8xf32>
    %15 = vector.shape_cast %12 : vector<8x8xf32> to vector<1x8x8xf32>
    tpu.vector_store %arg13[%c0_14, %c0_15, %c0_16], %15 {strides = array<i32>} : memref<4x8x8xf32, #tpu.memory_space<vmem>>, vector<1x8x8xf32>,
    %c0_17 = arith.constant 0 : index
    %c0_18 = arith.constant 0 : index
    %c0_19 = arith.constant 0 : index
    %16 = vector.load %arg6[%c0_17, %c0_18, %c0_19] : memref<4x32x8xf32, #tpu.memory_space<vmem>>, vector<1x32x8xf32>
    %17 = vector.shape_cast %16 : vector<1x32x8xf32> to vector<32x8xf32>
    %cst_20 = arith.constant dense<0.000000e+00> : vector<8x8xf32>
    %18 = tpu.matmul %3, %17, %cst_20 {dimension_numbers = #tpu.dot_dimension_numbers<[1], [0], [0], [1], [0, 0, 1, 1], [], []>} : vector<8x32xf32>, vector<32x8xf32>, vector<8x8xf32> -> vector<8x8xf32>
    %c0_21 = arith.constant 0 : index
    %c0_22 = arith.constant 0 : index
    %c0_23 = arith.constant 0 : index
    %19 = vector.load %arg7[%c0_21, %c0_22, %c0_23] : memref<4x1x8xf32, #tpu.memory_space<vmem>>, vector<1x1x8xf32>
    %20 = vector.shape_cast %19 : vector<1x1x8xf32> to vector<1x8xf32>
    %21 = vector.broadcast %20 : vector<1x8xf32> to vector<8x8xf32>
    %22 = arith.addf %18, %21 : vector<8x8xf32>
    %c0_24 = arith.constant 0 : index
    %c0_25 = arith.constant 0 : index
    %c0_26 = arith.constant 0 : index
    %23 = vector.load %arg14[%c0_24, %c0_25, %c0_26] : memref<4x8x8xf32, #tpu.memory_space<vmem>>, vector<1x8x8xf32>
    %24 = vector.shape_cast %23 : vector<1x8x8xf32> to vector<8x8xf32>
    %25 = vector.shape_cast %22 : vector<8x8xf32> to vector<1x8x8xf32>
    tpu.vector_store %arg14[%c0_24, %c0_25, %c0_26], %25 {strides = array<i32>} : memref<4x8x8xf32, #tpu.memory_space<vmem>>, vector<1x8x8xf32>,
    %c0_27 = arith.constant 0 : index
    %c0_28 = arith.constant 0 : index
    %c0_29 = arith.constant 0 : index
    %26 = vector.load %arg8[%c0_27, %c0_28, %c0_29] : memref<4x32x8xf32, #tpu.memory_space<vmem>>, vector<1x32x8xf32>
    %27 = vector.shape_cast %26 : vector<1x32x8xf32> to vector<32x8xf32>
    %cst_30 = arith.constant dense<0.000000e+00> : vector<8x8xf32>
    %28 = tpu.matmul %5, %27, %cst_30 {dimension_numbers = #tpu.dot_dimension_numbers<[1], [0], [0], [1], [0, 0, 1, 1], [], []>} : vector<8x32xf32>, vector<32x8xf32>, vector<8x8xf32> -> vector<8x8xf32>
    %c0_31 = arith.constant 0 : index
    %c0_32 = arith.constant 0 : index
    %c0_33 = arith.constant 0 : index
    %29 = vector.load %arg9[%c0_31, %c0_32, %c0_33] : memref<4x1x8xf32, #tpu.memory_space<vmem>>, vector<1x1x8xf32>
    %30 = vector.shape_cast %29 : vector<1x1x8xf32> to vector<1x8xf32>
    %31 = vector.broadcast %30 : vector<1x8xf32> to vector<8x8xf32>
    %32 = arith.addf %28, %31 : vector<8x8xf32>
    %c0_34 = arith.constant 0 : index
    %c0_35 = arith.constant 0 : index
    %c0_36 = arith.constant 0 : index
    %33 = vector.load %arg15[%c0_34, %c0_35, %c0_36] : memref<4x8x8xf32, #tpu.memory_space<vmem>>, vector<1x8x8xf32>
    %34 = vector.shape_cast %33 : vector<1x8x8xf32> to vector<8x8xf32>
    %35 = vector.shape_cast %32 : vector<8x8xf32> to vector<1x8x8xf32>
    tpu.vector_store %arg15[%c0_34, %c0_35, %c0_36], %35 {strides = array<i32>} : memref<4x8x8xf32, #tpu.memory_space<vmem>>, vector<1x8x8xf32>,
    %c1 = arith.constant 1 : index
    %c0_37 = arith.constant 0 : index
    %c0_38 = arith.constant 0 : index
    %36 = vector.load %arg4[%c1, %c0_37, %c0_38] : memref<4x32x8xf32, #tpu.memory_space<vmem>>, vector<1x32x8xf32>
    %37 = vector.shape_cast %36 : vector<1x32x8xf32> to vector<32x8xf32>
    %cst_39 = arith.constant dense<0.000000e+00> : vector<8x8xf32>
    %38 = tpu.matmul %1, %37, %cst_39 {dimension_numbers = #tpu.dot_dimension_numbers<[1], [0], [0], [1], [0, 0, 1, 1], [], []>} : vector<8x32xf32>, vector<32x8xf32>, vector<8x8xf32> -> vector<8x8xf32>
    %c1_40 = arith.constant 1 : index
    %c0_41 = arith.constant 0 : index
    %c0_42 = arith.constant 0 : index
    %39 = vector.load %arg5[%c1_40, %c0_41, %c0_42] : memref<4x1x8xf32, #tpu.memory_space<vmem>>, vector<1x1x8xf32>
    %40 = vector.shape_cast %39 : vector<1x1x8xf32> to vector<1x8xf32>
    %41 = vector.broadcast %40 : vector<1x8xf32> to vector<8x8xf32>
    %42 = arith.addf %38, %41 : vector<8x8xf32>
    %c1_43 = arith.constant 1 : index
    %c0_44 = arith.constant 0 : index
    %c0_45 = arith.constant 0 : index
    %43 = vector.load %arg13[%c1_43, %c0_44, %c0_45] : memref<4x8x8xf32, #tpu.memory_space<vmem>>, vector<1x8x8xf32>
    %44 = vector.shape_cast %43 : vector<1x8x8xf32> to vector<8x8xf32>
    %45 = vector.shape_cast %42 : vector<8x8xf32> to vector<1x8x8xf32>
    tpu.vector_store %arg13[%c1_43, %c0_44, %c0_45], %45 {strides = array<i32>} : memref<4x8x8xf32, #tpu.memory_space<vmem>>, vector<1x8x8xf32>,
    %c1_46 = arith.constant 1 : index
    %c0_47 = arith.constant 0 : index
    %c0_48 = arith.constant 0 : index
    %46 = vector.load %arg6[%c1_46, %c0_47, %c0_48] : memref<4x32x8xf32, #tpu.memory_space<vmem>>, vector<1x32x8xf32>
    %47 = vector.shape_cast %46 : vector<1x32x8xf32> to vector<32x8xf32>
    %cst_49 = arith.constant dense<0.000000e+00> : vector<8x8xf32>
    %48 = tpu.matmul %3, %47, %cst_49 {dimension_numbers = #tpu.dot_dimension_numbers<[1], [0], [0], [1], [0, 0, 1, 1], [], []>} : vector<8x32xf32>, vector<32x8xf32>, vector<8x8xf32> -> vector<8x8xf32>
    %c1_50 = arith.constant 1 : index
    %c0_51 = arith.constant 0 : index
    %c0_52 = arith.constant 0 : index
    %49 = vector.load %arg7[%c1_50, %c0_51, %c0_52] : memref<4x1x8xf32, #tpu.memory_space<vmem>>, vector<1x1x8xf32>
    %50 = vector.shape_cast %49 : vector<1x1x8xf32> to vector<1x8xf32>
    %51 = vector.broadcast %50 : vector<1x8xf32> to vector<8x8xf32>
    %52 = arith.addf %48, %51 : vector<8x8xf32>
    %c1_53 = arith.constant 1 : index
    %c0_54 = arith.constant 0 : index
    %c0_55 = arith.constant 0 : index
    %53 = vector.load %arg14[%c1_53, %c0_54, %c0_55] : memref<4x8x8xf32, #tpu.memory_space<vmem>>, vector<1x8x8xf32>
    %54 = vector.shape_cast %53 : vector<1x8x8xf32> to vector<8x8xf32>
    %55 = vector.shape_cast %52 : vector<8x8xf32> to vector<1x8x8xf32>
    tpu.vector_store %arg14[%c1_53, %c0_54, %c0_55], %55 {strides = array<i32>} : memref<4x8x8xf32, #tpu.memory_space<vmem>>, vector<1x8x8xf32>,
    %c1_56 = arith.constant 1 : index
    %c0_57 = arith.constant 0 : index
    %c0_58 = arith.constant 0 : index
    %56 = vector.load %arg8[%c1_56, %c0_57, %c0_58] : memref<4x32x8xf32, #tpu.memory_space<vmem>>, vector<1x32x8xf32>
    %57 = vector.shape_cast %56 : vector<1x32x8xf32> to vector<32x8xf32>
    %cst_59 = arith.constant dense<0.000000e+00> : vector<8x8xf32>
    %58 = tpu.matmul %5, %57, %cst_59 {dimension_numbers = #tpu.dot_dimension_numbers<[1], [0], [0], [1], [0, 0, 1, 1], [], []>} : vector<8x32xf32>, vector<32x8xf32>, vector<8x8xf32> -> vector<8x8xf32>
    %c1_60 = arith.constant 1 : index
    %c0_61 = arith.constant 0 : index
    %c0_62 = arith.constant 0 : index
    %59 = vector.load %arg9[%c1_60, %c0_61, %c0_62] : memref<4x1x8xf32, #tpu.memory_space<vmem>>, vector<1x1x8xf32>
    %60 = vector.shape_cast %59 : vector<1x1x8xf32> to vector<1x8xf32>
    %61 = vector.broadcast %60 : vector<1x8xf32> to vector<8x8xf32>
    %62 = arith.addf %58, %61 : vector<8x8xf32>
    %c1_63 = arith.constant 1 : index
    %c0_64 = arith.constant 0 : index
    %c0_65 = arith.constant 0 : index
    %63 = vector.load %arg15[%c1_63, %c0_64, %c0_65] : memref<4x8x8xf32, #tpu.memory_space<vmem>>, vector<1x8x8xf32>
    %64 = vector.shape_cast %63 : vector<1x8x8xf32> to vector<8x8xf32>
    %65 = vector.shape_cast %62 : vector<8x8xf32> to vector<1x8x8xf32>
    tpu.vector_store %arg15[%c1_63, %c0_64, %c0_65], %65 {strides = array<i32>} : memref<4x8x8xf32, #tpu.memory_space<vmem>>, vector<1x8x8xf32>,
    %c2 = arith.constant 2 : index
    %c0_66 = arith.constant 0 : index
    %c0_67 = arith.constant 0 : index
    %66 = vector.load %arg4[%c2, %c0_66, %c0_67] : memref<4x32x8xf32, #tpu.memory_space<vmem>>, vector<1x32x8xf32>
    %67 = vector.shape_cast %66 : vector<1x32x8xf32> to vector<32x8xf32>
    %cst_68 = arith.constant dense<0.000000e+00> : vector<8x8xf32>
    %68 = tpu.matmul %1, %67, %cst_68 {dimension_numbers = #tpu.dot_dimension_numbers<[1], [0], [0], [1], [0, 0, 1, 1], [], []>} : vector<8x32xf32>, vector<32x8xf32>, vector<8x8xf32> -> vector<8x8xf32>
    %c2_69 = arith.constant 2 : index
    %c0_70 = arith.constant 0 : index
    %c0_71 = arith.constant 0 : index
    %69 = vector.load %arg5[%c2_69, %c0_70, %c0_71] : memref<4x1x8xf32, #tpu.memory_space<vmem>>, vector<1x1x8xf32>
    %70 = vector.shape_cast %69 : vector<1x1x8xf32> to vector<1x8xf32>
    %71 = vector.broadcast %70 : vector<1x8xf32> to vector<8x8xf32>
    %72 = arith.addf %68, %71 : vector<8x8xf32>
    %c2_72 = arith.constant 2 : index
    %c0_73 = arith.constant 0 : index
    %c0_74 = arith.constant 0 : index
    %73 = vector.load %arg13[%c2_72, %c0_73, %c0_74] : memref<4x8x8xf32, #tpu.memory_space<vmem>>, vector<1x8x8xf32>
    %74 = vector.shape_cast %73 : vector<1x8x8xf32> to vector<8x8xf32>
    %75 = vector.shape_cast %72 : vector<8x8xf32> to vector<1x8x8xf32>
    tpu.vector_store %arg13[%c2_72, %c0_73, %c0_74], %75 {strides = array<i32>} : memref<4x8x8xf32, #tpu.memory_space<vmem>>, vector<1x8x8xf32>,
    %c2_75 = arith.constant 2 : index
    %c0_76 = arith.constant 0 : index
    %c0_77 = arith.constant 0 : index
    %76 = vector.load %arg6[%c2_75, %c0_76, %c0_77] : memref<4x32x8xf32, #tpu.memory_space<vmem>>, vector<1x32x8xf32>
    %77 = vector.shape_cast %76 : vector<1x32x8xf32> to vector<32x8xf32>
    %cst_78 = arith.constant dense<0.000000e+00> : vector<8x8xf32>
    %78 = tpu.matmul %3, %77, %cst_78 {dimension_numbers = #tpu.dot_dimension_numbers<[1], [0], [0], [1], [0, 0, 1, 1], [], []>} : vector<8x32xf32>, vector<32x8xf32>, vector<8x8xf32> -> vector<8x8xf32>
    %c2_79 = arith.constant 2 : index
    %c0_80 = arith.constant 0 : index
    %c0_81 = arith.constant 0 : index
    %79 = vector.load %arg7[%c2_79, %c0_80, %c0_81] : memref<4x1x8xf32, #tpu.memory_space<vmem>>, vector<1x1x8xf32>
    %80 = vector.shape_cast %79 : vector<1x1x8xf32> to vector<1x8xf32>
    %81 = vector.broadcast %80 : vector<1x8xf32> to vector<8x8xf32>
    %82 = arith.addf %78, %81 : vector<8x8xf32>
    %c2_82 = arith.constant 2 : index
    %c0_83 = arith.constant 0 : index
    %c0_84 = arith.constant 0 : index
    %83 = vector.load %arg14[%c2_82, %c0_83, %c0_84] : memref<4x8x8xf32, #tpu.memory_space<vmem>>, vector<1x8x8xf32>
    %84 = vector.shape_cast %83 : vector<1x8x8xf32> to vector<8x8xf32>
    %85 = vector.shape_cast %82 : vector<8x8xf32> to vector<1x8x8xf32>
    tpu.vector_store %arg14[%c2_82, %c0_83, %c0_84], %85 {strides = array<i32>} : memref<4x8x8xf32, #tpu.memory_space<vmem>>, vector<1x8x8xf32>,
    %c2_85 = arith.constant 2 : index
    %c0_86 = arith.constant 0 : index
    %c0_87 = arith.constant 0 : index
    %86 = vector.load %arg8[%c2_85, %c0_86, %c0_87] : memref<4x32x8xf32, #tpu.memory_space<vmem>>, vector<1x32x8xf32>
    %87 = vector.shape_cast %86 : vector<1x32x8xf32> to vector<32x8xf32>
    %cst_88 = arith.constant dense<0.000000e+00> : vector<8x8xf32>
    %88 = tpu.matmul %5, %87, %cst_88 {dimension_numbers = #tpu.dot_dimension_numbers<[1], [0], [0], [1], [0, 0, 1, 1], [], []>} : vector<8x32xf32>, vector<32x8xf32>, vector<8x8xf32> -> vector<8x8xf32>
    %c2_89 = arith.constant 2 : index
    %c0_90 = arith.constant 0 : index
    %c0_91 = arith.constant 0 : index
    %89 = vector.load %arg9[%c2_89, %c0_90, %c0_91] : memref<4x1x8xf32, #tpu.memory_space<vmem>>, vector<1x1x8xf32>
    %90 = vector.shape_cast %89 : vector<1x1x8xf32> to vector<1x8xf32>
    %91 = vector.broadcast %90 : vector<1x8xf32> to vector<8x8xf32>
    %92 = arith.addf %88, %91 : vector<8x8xf32>
    %c2_92 = arith.constant 2 : index
    %c0_93 = arith.constant 0 : index
    %c0_94 = arith.constant 0 : index
    %93 = vector.load %arg15[%c2_92, %c0_93, %c0_94] : memref<4x8x8xf32, #tpu.memory_space<vmem>>, vector<1x8x8xf32>
    %94 = vector.shape_cast %93 : vector<1x8x8xf32> to vector<8x8xf32>
    %95 = vector.shape_cast %92 : vector<8x8xf32> to vector<1x8x8xf32>
    tpu.vector_store %arg15[%c2_92, %c0_93, %c0_94], %95 {strides = array<i32>} : memref<4x8x8xf32, #tpu.memory_space<vmem>>, vector<1x8x8xf32>,
    %c3 = arith.constant 3 : index
    %c0_95 = arith.constant 0 : index
    %c0_96 = arith.constant 0 : index
    %96 = vector.load %arg4[%c3, %c0_95, %c0_96] : memref<4x32x8xf32, #tpu.memory_space<vmem>>, vector<1x32x8xf32>
    %97 = vector.shape_cast %96 : vector<1x32x8xf32> to vector<32x8xf32>
    %cst_97 = arith.constant dense<0.000000e+00> : vector<8x8xf32>
    %98 = tpu.matmul %1, %97, %cst_97 {dimension_numbers = #tpu.dot_dimension_numbers<[1], [0], [0], [1], [0, 0, 1, 1], [], []>} : vector<8x32xf32>, vector<32x8xf32>, vector<8x8xf32> -> vector<8x8xf32>
    %c3_98 = arith.constant 3 : index
    %c0_99 = arith.constant 0 : index
    %c0_100 = arith.constant 0 : index
    %99 = vector.load %arg5[%c3_98, %c0_99, %c0_100] : memref<4x1x8xf32, #tpu.memory_space<vmem>>, vector<1x1x8xf32>
    %100 = vector.shape_cast %99 : vector<1x1x8xf32> to vector<1x8xf32>
    %101 = vector.broadcast %100 : vector<1x8xf32> to vector<8x8xf32>
    %102 = arith.addf %98, %101 : vector<8x8xf32>
    %c3_101 = arith.constant 3 : index
    %c0_102 = arith.constant 0 : index
    %c0_103 = arith.constant 0 : index
    %103 = vector.load %arg13[%c3_101, %c0_102, %c0_103] : memref<4x8x8xf32, #tpu.memory_space<vmem>>, vector<1x8x8xf32>
    %104 = vector.shape_cast %103 : vector<1x8x8xf32> to vector<8x8xf32>
    %105 = vector.shape_cast %102 : vector<8x8xf32> to vector<1x8x8xf32>
    tpu.vector_store %arg13[%c3_101, %c0_102, %c0_103], %105 {strides = array<i32>} : memref<4x8x8xf32, #tpu.memory_space<vmem>>, vector<1x8x8xf32>,
    %c3_104 = arith.constant 3 : index
    %c0_105 = arith.constant 0 : index
    %c0_106 = arith.constant 0 : index
    %106 = vector.load %arg6[%c3_104, %c0_105, %c0_106] : memref<4x32x8xf32, #tpu.memory_space<vmem>>, vector<1x32x8xf32>
    %107 = vector.shape_cast %106 : vector<1x32x8xf32> to vector<32x8xf32>
    %cst_107 = arith.constant dense<0.000000e+00> : vector<8x8xf32>
    %108 = tpu.matmul %3, %107, %cst_107 {dimension_numbers = #tpu.dot_dimension_numbers<[1], [0], [0], [1], [0, 0, 1, 1], [], []>} : vector<8x32xf32>, vector<32x8xf32>, vector<8x8xf32> -> vector<8x8xf32>
    %c3_108 = arith.constant 3 : index
    %c0_109 = arith.constant 0 : index
    %c0_110 = arith.constant 0 : index
    %109 = vector.load %arg7[%c3_108, %c0_109, %c0_110] : memref<4x1x8xf32, #tpu.memory_space<vmem>>, vector<1x1x8xf32>
    %110 = vector.shape_cast %109 : vector<1x1x8xf32> to vector<1x8xf32>
    %111 = vector.broadcast %110 : vector<1x8xf32> to vector<8x8xf32>
    %112 = arith.addf %108, %111 : vector<8x8xf32>
    %c3_111 = arith.constant 3 : index
    %c0_112 = arith.constant 0 : index
    %c0_113 = arith.constant 0 : index
    %113 = vector.load %arg14[%c3_111, %c0_112, %c0_113] : memref<4x8x8xf32, #tpu.memory_space<vmem>>, vector<1x8x8xf32>
    %114 = vector.shape_cast %113 : vector<1x8x8xf32> to vector<8x8xf32>
    %115 = vector.shape_cast %112 : vector<8x8xf32> to vector<1x8x8xf32>
    tpu.vector_store %arg14[%c3_111, %c0_112, %c0_113], %115 {strides = array<i32>} : memref<4x8x8xf32, #tpu.memory_space<vmem>>, vector<1x8x8xf32>,
    %c3_114 = arith.constant 3 : index
    %c0_115 = arith.constant 0 : index
    %c0_116 = arith.constant 0 : index
    %116 = vector.load %arg8[%c3_114, %c0_115, %c0_116] : memref<4x32x8xf32, #tpu.memory_space<vmem>>, vector<1x32x8xf32>
    %117 = vector.shape_cast %116 : vector<1x32x8xf32> to vector<32x8xf32>
    %cst_117 = arith.constant dense<0.000000e+00> : vector<8x8xf32>
    %118 = tpu.matmul %5, %117, %cst_117 {dimension_numbers = #tpu.dot_dimension_numbers<[1], [0], [0], [1], [0, 0, 1, 1], [], []>} : vector<8x32xf32>, vector<32x8xf32>, vector<8x8xf32> -> vector<8x8xf32>
    %c3_118 = arith.constant 3 : index
    %c0_119 = arith.constant 0 : index
    %c0_120 = arith.constant 0 : index
    %119 = vector.load %arg9[%c3_118, %c0_119, %c0_120] : memref<4x1x8xf32, #tpu.memory_space<vmem>>, vector<1x1x8xf32>
    %120 = vector.shape_cast %119 : vector<1x1x8xf32> to vector<1x8xf32>
    %121 = vector.broadcast %120 : vector<1x8xf32> to vector<8x8xf32>
    %122 = arith.addf %118, %121 : vector<8x8xf32>
    %c3_121 = arith.constant 3 : index
    %c0_122 = arith.constant 0 : index
    %c0_123 = arith.constant 0 : index
    %123 = vector.load %arg15[%c3_121, %c0_122, %c0_123] : memref<4x8x8xf32, #tpu.memory_space<vmem>>, vector<1x8x8xf32>
    %124 = vector.shape_cast %123 : vector<1x8x8xf32> to vector<8x8xf32>
    %125 = vector.shape_cast %122 : vector<8x8xf32> to vector<1x8x8xf32>
    tpu.vector_store %arg15[%c3_121, %c0_122, %c0_123], %125 {strides = array<i32>} : memref<4x8x8xf32, #tpu.memory_space<vmem>>, vector<1x8x8xf32>,
    %c0_124 = arith.constant 0 : index
    %c0_125 = arith.constant 0 : index
    %c0_126 = arith.constant 0 : index
    %126 = vector.load %arg13[%c0_124, %c0_125, %c0_126] : memref<4x8x8xf32, #tpu.memory_space<vmem>>, vector<4x8x8xf32>
    %c0_127 = arith.constant 0 : index
    %c0_128 = arith.constant 0 : index
    %c0_129 = arith.constant 0 : index
    %127 = vector.load %arg14[%c0_127, %c0_128, %c0_129] : memref<4x8x8xf32, #tpu.memory_space<vmem>>, vector<4x8x8xf32>
    "tpu.trace_start"() <{level = 10 : i32, message = "hqd,hkd->hqk"}> : () -> ()
    %cst_130 = arith.constant dense<0.000000e+00> : vector<4x8x8xf32>
    %128 = tpu.matmul %126, %127, %cst_130 {dimension_numbers = #tpu.dot_dimension_numbers<[2], [2], [1], [1], [0, 0, 0, 1, 1, 1], [0], [0]>} : vector<4x8x8xf32>, vector<4x8x8xf32>, vector<4x8x8xf32> -> vector<4x8x8xf32>
    "tpu.trace_stop"() : () -> ()
    %cst_131 = arith.constant dense<0xFF800000> : vector<4x8xf32>
    %129 = vector.multi_reduction <maximumf>, %128, %cst_131 [2] : vector<4x8x8xf32> to vector<4x8xf32>
    %130 = vector.shape_cast %129 : vector<4x8xf32> to vector<4x8x1xf32>
    %131 = vector.broadcast %130 : vector<4x8x1xf32> to vector<4x8x8xf32>
    %132 = arith.subf %128, %131 : vector<4x8x8xf32>
    %133 = math.exp %132 : vector<4x8x8xf32>
    %cst_132 = arith.constant dense<0.000000e+00> : vector<4x8xf32>
    %134 = vector.multi_reduction <add>, %133, %cst_132 [2] : vector<4x8x8xf32> to vector<4x8xf32>
    %135 = vector.shape_cast %134 : vector<4x8xf32> to vector<4x8x1xf32>
    %136 = tpu.reciprocal %135 {approx = true} : vector<4x8x1xf32> -> vector<4x8x1xf32>
    %137 = arith.mulf %135, %136 : vector<4x8x1xf32>
    %cst_133 = arith.constant 2.000000e+00 : f32
    %138 = vector.broadcast %cst_133 : f32 to vector<4x8x1xf32>
    %139 = arith.subf %138, %137 : vector<4x8x1xf32>
    %140 = arith.mulf %136, %139 : vector<4x8x1xf32>
    %141 = vector.broadcast %140 : vector<4x8x1xf32> to vector<4x8x8xf32>
    %142 = arith.mulf %133, %141 : vector<4x8x8xf32>
    %c0_134 = arith.constant 0 : index
    %c0_135 = arith.constant 0 : index
    %c0_136 = arith.constant 0 : index
    %143 = vector.load %arg15[%c0_134, %c0_135, %c0_136] : memref<4x8x8xf32, #tpu.memory_space<vmem>>, vector<4x8x8xf32>
    "tpu.trace_start"() <{level = 10 : i32, message = "hqk,hkd->hqd"}> : () -> ()
    %cst_137 = arith.constant dense<0.000000e+00> : vector<4x8x8xf32>
    %144 = tpu.matmul %142, %143, %cst_137 {dimension_numbers = #tpu.dot_dimension_numbers<[2], [1], [1], [2], [0, 0, 0, 1, 1, 2], [0], [0]>} : vector<4x8x8xf32>, vector<4x8x8xf32>, vector<4x8x8xf32> -> vector<4x8x8xf32>
    %cst_138 = arith.constant 0.000000e+00 : f32
    "tpu.trace_stop"() : () -> ()
    %145 = vector.broadcast %cst_138 : f32 to vector<8x32xf32>
    %146 = vector.extract_strided_slice %144 {offsets = [0, 0, 0], sizes = [1, 8, 8], strides = [1, 1, 1]} : vector<4x8x8xf32> to vector<1x8x8xf32>
    %147 = vector.shape_cast %146 : vector<1x8x8xf32> to vector<8x8xf32>
    %c0_139 = arith.constant 0 : index
    %c0_140 = arith.constant 0 : index
    %c0_141 = arith.constant 0 : index
    %148 = vector.load %arg10[%c0_139, %c0_140, %c0_141] : memref<4x8x32xf32, #tpu.memory_space<vmem>>, vector<1x8x32xf32>
    %149 = vector.shape_cast %148 : vector<1x8x32xf32> to vector<8x32xf32>
    %cst_142 = arith.constant dense<0.000000e+00> : vector<8x32xf32>
    %150 = tpu.matmul %147, %149, %cst_142 {dimension_numbers = #tpu.dot_dimension_numbers<[1], [0], [0], [1], [0, 0, 1, 1], [], []>} : vector<8x8xf32>, vector<8x32xf32>, vector<8x32xf32> -> vector<8x32xf32>
    %151 = arith.addf %145, %150 : vector<8x32xf32>
    %152 = vector.extract_strided_slice %144 {offsets = [1, 0, 0], sizes = [1, 8, 8], strides = [1, 1, 1]} : vector<4x8x8xf32> to vector<1x8x8xf32>
    %153 = vector.shape_cast %152 : vector<1x8x8xf32> to vector<8x8xf32>
    %c1_143 = arith.constant 1 : index
    %c0_144 = arith.constant 0 : index
    %c0_145 = arith.constant 0 : index
    %154 = vector.load %arg10[%c1_143, %c0_144, %c0_145] : memref<4x8x32xf32, #tpu.memory_space<vmem>>, vector<1x8x32xf32>
    %155 = vector.shape_cast %154 : vector<1x8x32xf32> to vector<8x32xf32>
    %cst_146 = arith.constant dense<0.000000e+00> : vector<8x32xf32>
    %156 = tpu.matmul %153, %155, %cst_146 {dimension_numbers = #tpu.dot_dimension_numbers<[1], [0], [0], [1], [0, 0, 1, 1], [], []>} : vector<8x8xf32>, vector<8x32xf32>, vector<8x32xf32> -> vector<8x32xf32>
    %157 = arith.addf %151, %156 : vector<8x32xf32>
    %158 = vector.extract_strided_slice %144 {offsets = [2, 0, 0], sizes = [1, 8, 8], strides = [1, 1, 1]} : vector<4x8x8xf32> to vector<1x8x8xf32>
    %159 = vector.shape_cast %158 : vector<1x8x8xf32> to vector<8x8xf32>
    %c2_147 = arith.constant 2 : index
    %c0_148 = arith.constant 0 : index
    %c0_149 = arith.constant 0 : index
    %160 = vector.load %arg10[%c2_147, %c0_148, %c0_149] : memref<4x8x32xf32, #tpu.memory_space<vmem>>, vector<1x8x32xf32>
    %161 = vector.shape_cast %160 : vector<1x8x32xf32> to vector<8x32xf32>
    %cst_150 = arith.constant dense<0.000000e+00> : vector<8x32xf32>
    %162 = tpu.matmul %159, %161, %cst_150 {dimension_numbers = #tpu.dot_dimension_numbers<[1], [0], [0], [1], [0, 0, 1, 1], [], []>} : vector<8x8xf32>, vector<8x32xf32>, vector<8x32xf32> -> vector<8x32xf32>
    %163 = arith.addf %157, %162 : vector<8x32xf32>
    %164 = vector.extract_strided_slice %144 {offsets = [3, 0, 0], sizes = [1, 8, 8], strides = [1, 1, 1]} : vector<4x8x8xf32> to vector<1x8x8xf32>
    %165 = vector.shape_cast %164 : vector<1x8x8xf32> to vector<8x8xf32>
    %c3_151 = arith.constant 3 : index
    %c0_152 = arith.constant 0 : index
    %c0_153 = arith.constant 0 : index
    %166 = vector.load %arg10[%c3_151, %c0_152, %c0_153] : memref<4x8x32xf32, #tpu.memory_space<vmem>>, vector<1x8x32xf32>
    %167 = vector.shape_cast %166 : vector<1x8x32xf32> to vector<8x32xf32>
    %cst_154 = arith.constant dense<0.000000e+00> : vector<8x32xf32>
    %168 = tpu.matmul %165, %167, %cst_154 {dimension_numbers = #tpu.dot_dimension_numbers<[1], [0], [0], [1], [0, 0, 1, 1], [], []>} : vector<8x8xf32>, vector<8x32xf32>, vector<8x32xf32> -> vector<8x32xf32>
    %169 = arith.addf %163, %168 : vector<8x32xf32>
    %c0_155 = arith.constant 0 : index
    %c0_156 = arith.constant 0 : index
    %170 = vector.load %arg11[%c0_155, %c0_156] : memref<1x32xf32, #tpu.memory_space<vmem>>, vector<1x32xf32>
    %171 = vector.broadcast %170 : vector<1x32xf32> to vector<8x32xf32>
    %172 = arith.addf %169, %171 : vector<8x32xf32>
    %c0_157 = arith.constant 0 : index
    %c0_158 = arith.constant 0 : index
    %c0_159 = arith.constant 0 : index
    %173 = vector.load %arg12[%c0_157, %c0_158, %c0_159] : memref<1x8x32xf32, #tpu.memory_space<vmem>>, vector<1x8x32xf32>
    %174 = vector.shape_cast %173 : vector<1x8x32xf32> to vector<8x32xf32>
    %175 = vector.shape_cast %172 : vector<8x32xf32> to vector<1x8x32xf32>
    tpu.vector_store %arg12[%c0_157, %c0_158, %c0_159], %175 {strides = array<i32>} : memref<1x8x32xf32, #tpu.memory_space<vmem>>, vector<1x8x32xf32>,
    return
  }
  func.func @transform_0(%arg0: i32) -> (i32, i32, i32) {
    %c0_i32 = arith.constant 0 : i32
    %c0_i32_0 = arith.constant 0 : i32
    %c0_i32_1 = arith.constant 0 : i32
    return %arg0, %c0_i32, %c0_i32_0 : i32, i32, i32
  }
  func.func @transform_1(%arg0: i32) -> (i32, i32, i32) {
    %c0_i32 = arith.constant 0 : i32
    %c0_i32_0 = arith.constant 0 : i32
    %c0_i32_1 = arith.constant 0 : i32
    return %arg0, %c0_i32, %c0_i32_0 : i32, i32, i32
  }
  func.func @transform_2(%arg0: i32) -> (i32, i32, i32) {
    %c0_i32 = arith.constant 0 : i32
    %c0_i32_0 = arith.constant 0 : i32
    %c0_i32_1 = arith.constant 0 : i32
    return %arg0, %c0_i32, %c0_i32_0 : i32, i32, i32
  }
  func.func @transform_3(%arg0: i32) -> (i32, i32, i32) {
    %c0_i32 = arith.constant 0 : i32
    %c0_i32_0 = arith.constant 0 : i32
    %c0_i32_1 = arith.constant 0 : i32
    %c0_i32_2 = arith.constant 0 : i32
    return %c0_i32, %c0_i32_0, %c0_i32_1 : i32, i32, i32
  }
  func.func @transform_4(%arg0: i32) -> (i32, i32, i32) {
    %c0_i32 = arith.constant 0 : i32
    %c0_i32_0 = arith.constant 0 : i32
    %c0_i32_1 = arith.constant 0 : i32
    %c0_i32_2 = arith.constant 0 : i32
    return %c0_i32, %c0_i32_0, %c0_i32_1 : i32, i32, i32
  }
  func.func @transform_5(%arg0: i32) -> (i32, i32, i32) {
    %c0_i32 = arith.constant 0 : i32
    %c0_i32_0 = arith.constant 0 : i32
    %c0_i32_1 = arith.constant 0 : i32
    %c0_i32_2 = arith.constant 0 : i32
    return %c0_i32, %c0_i32_0, %c0_i32_1 : i32, i32, i32
  }
  func.func @transform_6(%arg0: i32) -> (i32, i32, i32) {
    %c0_i32 = arith.constant 0 : i32
    %c0_i32_0 = arith.constant 0 : i32
    %c0_i32_1 = arith.constant 0 : i32
    %c0_i32_2 = arith.constant 0 : i32
    return %c0_i32, %c0_i32_0, %c0_i32_1 : i32, i32, i32
  }
  func.func @transform_7(%arg0: i32) -> (i32, i32, i32) {
    %c0_i32 = arith.constant 0 : i32
    %c0_i32_0 = arith.constant 0 : i32
    %c0_i32_1 = arith.constant 0 : i32
    %c0_i32_2 = arith.constant 0 : i32
    return %c0_i32, %c0_i32_0, %c0_i32_1 : i32, i32, i32
  }
  func.func @transform_8(%arg0: i32) -> (i32, i32, i32) {
    %c0_i32 = arith.constant 0 : i32
    %c0_i32_0 = arith.constant 0 : i32
    %c0_i32_1 = arith.constant 0 : i32
    %c0_i32_2 = arith.constant 0 : i32
    return %c0_i32, %c0_i32_0, %c0_i32_1 : i32, i32, i32
  }
  func.func @transform_9(%arg0: i32) -> (i32, i32, i32) {
    %c0_i32 = arith.constant 0 : i32
    %c0_i32_0 = arith.constant 0 : i32
    %c0_i32_1 = arith.constant 0 : i32
    %c0_i32_2 = arith.constant 0 : i32
    return %c0_i32, %c0_i32_0, %c0_i32_1 : i32, i32, i32
  }
  func.func @transform_10(%arg0: i32) -> (i32, i32) {
    %c0_i32 = arith.constant 0 : i32
    %c0_i32_0 = arith.constant 0 : i32
    %c0_i32_1 = arith.constant 0 : i32
    return %c0_i32, %c0_i32_0 : i32, i32
  }
  func.func @transform_11(%arg0: i32) -> (i32, i32, i32) {
    %c0_i32 = arith.constant 0 : i32
    %c0_i32_0 = arith.constant 0 : i32
    %c0_i32_1 = arith.constant 0 : i32
    return %arg0, %c0_i32, %c0_i32_0 : i32, i32, i32
  }
}

</mosaic_0001>

<bundles_post_ra>
// kernel: tpu_custom_call.1
= control target key start
LH: loop header
LB: loop body
LE: loop exit
PB: predicated region body
PF: predicated region fallthrough
CT: control target
= control target key end

     0   :  { %s3539_s0 = inlined_call_operand.vmem [shape: f32[2,8,32], index: 0, kind: input, shape index: {}]   ;;  %s3540_s1 = inlined_call_operand.vmem [shape: f32[2,8,32], index: 1, kind: input, shape index: {}]   ;;  %s3541_s2 = inlined_call_operand.vmem [shape: f32[2,8,32], index: 2, kind: input, shape index: {}]   ;;  %s3542_s3 = inlined_call_operand.vmem [shape: f32[4,32,8], index: 3, kind: input, shape index: {}]   ;;  %s3543_s4 = inlined_call_operand.vmem [shape: f32[4,1,8], index: 4, kind: input, shape index: {}]   ;;  %s3544_s5 = inlined_call_operand.vmem [shape: f32[4,32,8], index: 5, kind: input, shape index: {}]   ;;  %s3545_s6 = inlined_call_operand.vmem [shape: f32[4,1,8], index: 6, kind: input, shape index: {}]   ;;  %s3546_s7 = inlined_call_operand.vmem [shape: f32[4,32,8], index: 7, kind: input, shape index: {}]   ;;  %s3547_s8 = inlined_call_operand.vmem [shape: f32[4,1,8], index: 8, kind: input, shape index: {}]   ;;  %s3548_s9 = inlined_call_operand.vmem [shape: f32[4,8,32], index: 9, kind: input, shape index: {}]   ;;  %s3549_s10 = inlined_call_operand.vmem [shape: f32[1,32], index: 10, kind: input, shape index: {}]   ;;  %s3550_s11 = inlined_call_operand.hbm [shape: f32[2,8,32], index: 11, kind: output, shape index: {}]  }
   0x1   :  { %3551 = sst [smem:[#allocation9_spill]] %s3539_s0 }
   0x2   :  { %16 = vsyncpa [#allocation6], 0 }
   0x3   :  { %18 = vsyncpa [#allocation6 + $0x1], 0  ;;  %s3071_s17 = smov 0   ;;  %s3073_s18 = smov 0  }
   0x4   :  { %s3075_s19 = smov 0   ;;  %s3077_s20 = smov 0  }
   0x5 LB: > { %s3092_s21 = sadd.s32 4294967295, %s3006_s20   ;;  %s2512_s22 = sadd.s32 4294967294, %s3006_s20   ;;  %s3006_s20 = sphi %s3077_s20, %s3560_s20   ;;  %s3002_s19 = sphi %s3075_s19, %s3559_s19   ;;  %s2998_s18 = sphi %s3073_s18, %s3558_s18   ;;  %s2994_s17 = sphi %s3071_s17, %s3557_s17  }
   0x6   : > { %s3096_s23 = sadd.s32 1, %s3006_s20   ;;  %s277_s24 = sadd.s32 1, %s3002_s19 }
   0x7   : > { %s274_s25 = ssub.s32 %s3006_s20, %s3096_s23  ;;  %p287_p0 = scmp.ne.s32.totalorder %s3002_s19, %s2998_s18 }
   0x8   : > { %p275_p1 = scmp.eq.s32.totalorder %s274_s25, 0  ;;  %p288_p2 = scmp.eq.s32.totalorder %s3092_s21, 1 }
   0x9   : > { %p293_p3 = scmp.ne.s32.totalorder %s2998_s18, %s2994_s17  ;;  %p294_p4 = scmp.eq.s32.totalorder %s2512_s22, 1 }
   0xa   : > { %s3107_s26 = scalar_select %p275_p1, %s3002_s19, %s277_s24  }
   0xb   : > { %p3109_p5 = por %p288_p2, %p287_p0  ;;  %p3113_p6 = por %p294_p4, %p293_p3 }
   0xc   : > { %3552 = sst [smem:[#allocation8_spill]] %s3107_s26  ;;  %p2515_p7 = scmp.ge.s32.totalorder %s3006_s20, 1 }
   0xd   : > { %p357_p8 = scmp.lt.s32.totalorder %s3006_s20, 3 }
   0xf   : > { %p358_p9 = pnand %p2515_p7, %p357_p8 }
  0x10   : > { %p404_p10 = scmp.lt.s32.totalorder (!%p358_p9), %s3092_s21, 1  ;;  %s3555_s0 = sld [smem:[#allocation9_spill]] (!%p358_p9) }
  0x11   : > { %361 = sbr.rel (%p358_p9) target bundleno = 1199 (0x4af), region = 64  ;;  %s401_s29 = sand.u32 (!%p358_p9), 1, %s2998_s18  }
  0x12   : > { %s2516_s30 = sshll.u32 (!%p358_p9), %s401_s29, 3 }
  0x13   : > { %s403_s26 = scalar_lea.vmem (!%p358_p9), [#allocation5], %s2516_s30 }
  0x14   : > { %s2429_s14 = sshll.u32 (!%p358_p9), %s403_s26, 4  ;;  %s2430_s14 = int_to_ptr.vmem [resolvable:$true] %s2429_s14 }
  0x16   : > { %v422_v0 = vld [vmem:[%s3542_s3 + $0x18] sm:$0xff]  ;;  %v3008_v2 = vmov 0.0   ;;  %v421_v3 = vld [vmem:[%s3542_s3 + $0x10] sm:$0xff]  ;;  %s405_s24 = scalar_select %p404_p10, %s3092_s21, 1  ;;  %v420_v5 = vld [vmem:[%s3542_s3 + $0x8] sm:$0xff]  ;;  %vm430_vm0 = vcmask 261120  }
  0x17   : > { %v509_v1 = vld [vmem:[%s3544_s5 + $0x18] sm:$0xff]  ;;  %2697 = vmatprep.subr.mxu0 %v3008_v2  ;;  %2708 = vmatprep.subr.mxu1 %v3008_v2  ;;  %v508_v4 = vld [vmem:[%s3544_s5 + $0x10] sm:$0xff]  ;;  %v507_v6 = vld [vmem:[%s3544_s5 + $0x8] sm:$0xff]  ;;  %vm3009_vm1 = vmmov 0   ;;  %vm504_vm2 = vcmask 64512  }
  0x18   : > { %2698 = vmatpush3.msra.mxu0 %v422_v0  ;;  %2709 = vmatpush3.msra.mxu1 %v509_v1  ;;  %s3143_s13 = sshll.u32 %s405_s24, 3  ;;  %v419_v7 = vld [vmem:[%s3542_s3] sm:$0xff]  ;;  %v594_v11 = vld [vmem:[%s3546_s7 + $0x18] sm:$0xff]  ;;  %v593_v13 = vld [vmem:[%s3546_s7 + $0x10] sm:$0xff]  ;;  %s2610_s24 = sshll.u32 %s3092_s21, 7 }
  0x19   : > { %2699 = vmatprep.subr.mxu0 %v3008_v2  ;;  %2710 = vmatprep.subr.mxu1 %v3008_v2  ;;  %s407_s25 = scalar_lea.vmem %s3555_s0, %s3143_s13  ;;  %s411_s12 = scalar_lea.vmem %s3540_s1, %s3143_s13  ;;  %v506_v8 = vld [vmem:[%s3544_s5] sm:$0xff]  ;;  %v2529_v12 = vld [vmem:[%s3542_s3 + $0x38] sm:$0xff]  ;;  %v2528_v14 = vld [vmem:[%s3542_s3 + $0x30] sm:$0xff] }
  0x1a   : > { %2700 = vmatpush3.msra.mxu0 %v421_v3  ;;  %2711 = vmatpush3.msra.mxu1 %v508_v4  ;;  %v3163_v9 = vld [vmem:[%s407_s25] sm:$0xff]  ;;  %v592_v15 = vld [vmem:[%s3546_s7 + $0x8] sm:$0xff]  ;;  %s415_s22 = scalar_lea.vmem %s3541_s2, %s3143_s13  ;;  %v2536_v20 = vld [vmem:[%s3544_s5 + $0x38] sm:$0xff]  ;;  %s2416_s25 = scalar_lea.sflag [#allocation6], %s401_s29 }
  0x1b   : > { %2701 = vmatprep.subr.mxu0 %v3008_v2  ;;  %2712 = vmatprep.subr.mxu1 %v3008_v2  ;;  %v3165_v10 = vld [vmem:[%s411_s12] sm:$0xff]  ;;  %v2527_v16 = vld [vmem:[%s3542_s3 + $0x28] sm:$0xff]  ;;  %v2543_v21 = vld [vmem:[%s3546_s7 + $0x38] sm:$0xff]  ;;  %s2946_s0 = scalar_lea.vmem %s2430_s14, 128  ;;  %s3010_s12 = smov [#allocation5]  }
  0x1c   : > { %2702 = vmatpush3.msra.mxu0 %v420_v5  ;;  %2713 = vmatpush3.msra.mxu1 %v507_v6  ;;  %v591_v17 = vld [vmem:[%s3546_s7] sm:$0xff]  ;;  %v2535_v22 = vld [vmem:[%s3544_s5 + $0x30] sm:$0xff]  ;;  %v2534_v24 = vld [vmem:[%s3544_s5 + $0x28] sm:$0xff]  ;;  %p2947_p11 = scmp.ne.s32.totalorder %s2430_s14, %s2946_s0  ;;  %s2950_s21 = sshll.u32 %s3010_s12, 4  ;;  %s2951_s21 = int_to_ptr.vmem [resolvable:$false] %s2950_s21 }
  0x1d   : > { %2703 = vmatprep.subr.mxu0 %v3008_v2  ;;  %2714 = vmatprep.subr.mxu1 %v3008_v2  ;;  %v2526_v18 = vld [vmem:[%s3542_s3 + $0x20] sm:$0xff]  ;;  %v2542_v23 = vld [vmem:[%s3546_s7 + $0x30] sm:$0xff]  ;;  %v2541_v25 = vld [vmem:[%s3546_s7 + $0x28] sm:$0xff]  ;;  %s2952_s30 = scalar_lea.vmem %s2951_s21, 256  ;;  %p2953_p0 = scmp.lt.s32.totalorder %s2430_s14, %s2951_s21 }
  0x1e   : > { %2704 = vmatpush3.msra.mxu0 %v419_v7  ;;  %2705 = vmatprep.mubr.msk.f32.mxu0 %vm3009_vm1, %v3008_v2  ;;  %v3209_v19 = vld [vmem:[%s415_s22] sm:$0xff]  ;;  %v2550_v28 = vld [vmem:[%s3542_s3 + $0x58] sm:$0xff]  ;;  %v2549_v30 = vld [vmem:[%s3542_s3 + $0x50] sm:$0xff]  ;;  %s2427_s22 = scalar_lea.hbm %s3550_s11, %s2610_s24  ;;  %p2948_p12 = pnand %p2947_p11, %p3109_p5 }
  0x1f   : > { %2715 = vmatpush3.msra.mxu1 %v506_v8  ;;  %2716 = vmatprep.mubr.msk.f32.mxu1 %vm3009_vm1, %v3008_v2  ;;  %v2533_v26 = vld [vmem:[%s3544_s5 + $0x20] sm:$0xff]  ;;  %v2557_v29 = vld [vmem:[%s3544_s5 + $0x58] sm:$0xff]  ;;  %v2556_v31 = vld [vmem:[%s3544_s5 + $0x50] sm:$0xff]  ;;  %p2954_p1 = scmp.lt.s32.totalorder %s2952_s30, %s2946_s0 }
  0x20   : > { %2706 = vmatmul.mubr.msk.f32.vlgmr.msra.gmra.mxu0 %vm430_vm0, %v3163_v9  ;;  %2717 = vmatmul.mubr.msk.f32.vlgmr.msra.gmra.mxu1 %vm430_vm0, %v3165_v10  ;;  %v2540_v27 = vld [vmem:[%s3546_s7 + $0x20] sm:$0xff]  ;;  %v2548_v32 = vld [vmem:[%s3542_s3 + $0x48] sm:$0xff]  ;;  %v2564_v36 = vld [vmem:[%s3546_s7 + $0x58] sm:$0xff]  ;;  %p2949_p13 = pneg %p2948_p12 }
  0x21   : > { %2719 = vmatprep.subr.mxu0 %v3008_v2  ;;  %2730 = vmatprep.subr.mxu1 %v3008_v2  ;;  %v2555_v33 = vld [vmem:[%s3544_s5 + $0x48] sm:$0xff]  ;;  %v2547_v34 = vld [vmem:[%s3542_s3 + $0x40] sm:$0xff]  ;;  %v2571_v37 = vld [vmem:[%s3542_s3 + $0x78] sm:$0xff]  ;;  %p2955_p2 = por %p2954_p1, %p2953_p0 }
  0x22   : > { %2720 = vmatpush3.msra.mxu0 %v594_v11  ;;  %2731 = vmatpush3.msra.mxu1 %v2529_v12  ;;  %v2554_v35 = vld [vmem:[%s3544_s5 + $0x40] sm:$0xff]  ;;  %v2563_v38 = vld [vmem:[%s3546_s7 + $0x50] sm:$0xff]  ;;  %v2562_v40 = vld [vmem:[%s3546_s7 + $0x48] sm:$0xff] }
  0x23   : > { %2721 = vmatprep.subr.mxu0 %v3008_v2  ;;  %2732 = vmatprep.subr.mxu1 %v3008_v2  ;;  %v2570_v39 = vld [vmem:[%s3542_s3 + $0x70] sm:$0xff]  ;;  %v2569_v41 = vld [vmem:[%s3542_s3 + $0x68] sm:$0xff]  ;;  %v2561_v42 = vld [vmem:[%s3546_s7 + $0x40] sm:$0xff]  ;;  %p2956_p3 = pnand %p2955_p2, %p2949_p13 }
  0x24   : > { %2722 = vmatpush3.msra.mxu0 %v593_v13  ;;  %2733 = vmatpush3.msra.mxu1 %v2528_v14  ;;  %v2578_v43 = vld [vmem:[%s3544_s5 + $0x78] sm:$0xff]  ;;  %v2568_v44 = vld [vmem:[%s3542_s3 + $0x60] sm:$0xff]  ;;  %v2577_v45 = vld [vmem:[%s3544_s5 + $0x70] sm:$0xff] }
  0x25   : > { %2723 = vmatprep.subr.mxu0 %v3008_v2  ;;  %2734 = vmatprep.subr.mxu1 %v3008_v2  ;;  %v2576_v46 = vld [vmem:[%s3544_s5 + $0x68] sm:$0xff]  ;;  %v2575_v47 = vld [vmem:[%s3544_s5 + $0x60] sm:$0xff]  ;;  %v2585_v48 = vld [vmem:[%s3546_s7 + $0x78] sm:$0xff] }
  0x26   : > { %2724 = vmatpush3.msra.mxu0 %v592_v15  ;;  %2735 = vmatpush3.msra.mxu1 %v2527_v16  ;;  %v2584_v49 = vld [vmem:[%s3546_s7 + $0x70] sm:$0xff]  ;;  %v2583_v50 = vld [vmem:[%s3546_s7 + $0x68] sm:$0xff]  ;;  %v2582_v51 = vld [vmem:[%s3546_s7 + $0x60] sm:$0xff] }
  0x27   : > { %2725 = vmatprep.subr.mxu0 %v3008_v2  ;;  %2736 = vmatprep.subr.mxu1 %v3008_v2  ;;  %v2520_v52 = vld [vmem:[%s3543_s4] ss:$0 sm:$0xff]  ;;  %v2531_v62 = vld [vmem:[%s3543_s4 + $0x1] ss:$0 sm:$0xff]  ;;  %v2552_v15 = vld [vmem:[%s3543_s4 + $0x2] ss:$0 sm:$0xff] }
  0x28   : > { %2726 = vmatpush3.msra.mxu0 %v591_v17  ;;  %2727 = vmatprep.mubr.msk.f32.mxu0 %vm3009_vm1, %v3008_v2  ;;  %v2522_v53 = vld [vmem:[%s3545_s6] ss:$0 sm:$0xff]  ;;  %v2538_v7 = vld [vmem:[%s3545_s6 + $0x1] ss:$0 sm:$0xff]  ;;  %v2559_v16 = vld [vmem:[%s3545_s6 + $0x2] ss:$0 sm:$0xff] }
  0x29   : > { %2737 = vmatpush3.msra.mxu1 %v2526_v18  ;;  %2728 = vmatmul.mubr.msk.f32.vlgmr.msra.gmra.mxu0 %vm430_vm0, %v3209_v19  ;;  %v2524_v60 = vld [vmem:[%s3547_s8] ss:$0 sm:$0xff] }
  0x2a   : > { %2738 = vmatprep.mubr.msk.f32.mxu1 %vm3009_vm1, %v3008_v2  ;;  %2741 = vmatprep.subr.mxu0 %v3008_v2 }
  0x2b   : > { %2752 = vmatprep.subr.mxu1 %v3008_v2  ;;  %2739 = vmatmul.mubr.msk.f32.vlgmr.msra.gmra.mxu1 %vm430_vm0, %v3163_v9 }
  0x2c   : > { %2742 = vmatpush3.msra.mxu0 %v2536_v20  ;;  %2753 = vmatpush3.msra.mxu1 %v2543_v21 }
  0x2d   : > { %2743 = vmatprep.subr.mxu0 %v3008_v2  ;;  %2754 = vmatprep.subr.mxu1 %v3008_v2 }
  0x2e   : > { %2744 = vmatpush3.msra.mxu0 %v2535_v22  ;;  %2755 = vmatpush3.msra.mxu1 %v2542_v23 }
  0x2f   : > { %2745 = vmatprep.subr.mxu0 %v3008_v2  ;;  %2756 = vmatprep.subr.mxu1 %v3008_v2 }
  0x30   : > { %2746 = vmatpush3.msra.mxu0 %v2534_v24  ;;  %2757 = vmatpush3.msra.mxu1 %v2541_v25  ;;  %v2566_v25 = vld [vmem:[%s3547_s8 + $0x2] ss:$0 sm:$0xff] }
  0x31   : > { %2747 = vmatprep.subr.mxu0 %v3008_v2  ;;  %2758 = vmatprep.subr.mxu1 %v3008_v2 }
  0x32   : > { %2748 = vmatpush3.msra.mxu0 %v2533_v26  ;;  %2749 = vmatprep.mubr.msk.f32.mxu0 %vm3009_vm1, %v3008_v2 }
  0x33   : > { %2759 = vmatpush3.msra.mxu1 %v2540_v27  ;;  %2750 = vmatmul.mubr.msk.f32.vlgmr.msra.gmra.mxu0 %vm430_vm0, %v3165_v10 }
  0x34   : > { %2760 = vmatprep.mubr.msk.f32.mxu1 %vm3009_vm1, %v3008_v2  ;;  %2763 = vmatprep.subr.mxu0 %v3008_v2 }
  0x35   : > { %2774 = vmatprep.subr.mxu1 %v3008_v2  ;;  %2761 = vmatmul.mubr.msk.f32.vlgmr.msra.gmra.mxu1 %vm430_vm0, %v3209_v19 }
  0x36   : > { %2764 = vmatpush3.msra.mxu0 %v2550_v28  ;;  %2775 = vmatpush3.msra.mxu1 %v2557_v29 }
  0x37   : > { %2765 = vmatprep.subr.mxu0 %v3008_v2  ;;  %2776 = vmatprep.subr.mxu1 %v3008_v2 }
  0x38   : > { %2766 = vmatpush3.msra.mxu0 %v2549_v30  ;;  %2777 = vmatpush3.msra.mxu1 %v2556_v31  ;;  %v2573_v30 = vld [vmem:[%s3543_s4 + $0x3] ss:$0 sm:$0xff] }
  0x39   : > { %2767 = vmatprep.subr.mxu0 %v3008_v2  ;;  %2778 = vmatprep.subr.mxu1 %v3008_v2 }
  0x3a   : > { %2768 = vmatpush3.msra.mxu0 %v2548_v32  ;;  %2779 = vmatpush3.msra.mxu1 %v2555_v33 }
  0x3b   : > { %2769 = vmatprep.subr.mxu0 %v3008_v2  ;;  %2780 = vmatprep.subr.mxu1 %v3008_v2 }
  0x3c   : > { %2770 = vmatpush3.msra.mxu0 %v2547_v34  ;;  %2771 = vmatprep.mubr.msk.f32.mxu0 %vm3009_vm1, %v3008_v2 }
  0x3d   : > { %2781 = vmatpush3.msra.mxu1 %v2554_v35  ;;  %2782 = vmatprep.mubr.msk.f32.mxu1 %vm3009_vm1, %v3008_v2  ;;  %v2580_v35 = vld [vmem:[%s3545_s6 + $0x3] ss:$0 sm:$0xff] }
  0x3e   : > { %2772 = vmatmul.mubr.msk.f32.vlgmr.msra.gmra.mxu0 %vm430_vm0, %v3163_v9  ;;  %2783 = vmatmul.mubr.msk.f32.vlgmr.msra.gmra.mxu1 %vm430_vm0, %v3165_v10 }
  0x3f   : > { %2785 = vmatprep.subr.mxu0 %v3008_v2  ;;  %2793 = vmatprep.mubr.msk.f32.mxu0 %vm3009_vm1, %v3008_v2 }
  0x40   : > { %2786 = vmatpush3.msra.mxu0 %v2564_v36  ;;  %2796 = vmatprep.subr.mxu1 %v3008_v2 }
  0x41   : > { %2787 = vmatprep.subr.mxu0 %v3008_v2  ;;  %2797 = vmatpush3.msra.mxu1 %v2571_v37 }
  0x42   : > { %2788 = vmatpush3.msra.mxu0 %v2563_v38  ;;  %2798 = vmatprep.subr.mxu1 %v3008_v2 }
  0x43   : > { %2789 = vmatprep.subr.mxu0 %v3008_v2  ;;  %2799 = vmatpush3.msra.mxu1 %v2570_v39 }
  0x44   : > { %2790 = vmatpush3.msra.mxu0 %v2562_v40  ;;  %2800 = vmatprep.subr.mxu1 %v3008_v2 }
  0x45   : > { %2791 = vmatprep.subr.mxu0 %v3008_v2  ;;  %2801 = vmatpush3.msra.mxu1 %v2569_v41 }
  0x46   : > { %2792 = vmatpush3.msra.mxu0 %v2561_v42  ;;  %2802 = vmatprep.subr.mxu1 %v3008_v2 }
  0x47   : > { %2794 = vmatmul.mubr.msk.f32.vlgmr.msra.gmra.mxu0 %vm430_vm0, %v3209_v19  ;;  %2807 = vmatprep.subr.mxu0 %v3008_v2 }
  0x48   : > { %2808 = vmatpush3.msra.mxu0 %v2578_v43  ;;  %2815 = vmatprep.mubr.msk.f32.mxu0 %vm3009_vm1, %v3008_v2  ;;  %v2587_v43 = vld [vmem:[%s3547_s8 + $0x3] ss:$0 sm:$0xff] }
  0x49   : > { %2809 = vmatprep.subr.mxu0 %v3008_v2  ;;  %2803 = vmatpush3.msra.mxu1 %v2568_v44 }
  0x4a   : > { %2810 = vmatpush3.msra.mxu0 %v2577_v45  ;;  %2804 = vmatprep.mubr.msk.f32.mxu1 %vm3009_vm1, %v3008_v2 }
  0x4b   : > { %2811 = vmatprep.subr.mxu0 %v3008_v2  ;;  %2805 = vmatmul.mubr.msk.f32.vlgmr.msra.gmra.mxu1 %vm430_vm0, %v3163_v9  ;;  %v2545_v9 = vld [vmem:[%s3547_s8 + $0x1] ss:$0 sm:$0xff] }
  0x4c   : > { %2812 = vmatpush3.msra.mxu0 %v2576_v46  ;;  %2818 = vmatprep.subr.mxu1 %v3008_v2 }
  0x4d   : > { %2813 = vmatprep.subr.mxu0 %v3008_v2  ;;  %2826 = vmatprep.mubr.msk.f32.mxu1 %vm3009_vm1, %v3008_v2 }
  0x4e   : > { %2814 = vmatpush3.msra.mxu0 %v2575_v47  ;;  %2819 = vmatpush3.msra.mxu1 %v2585_v48 }
  0x4f   : > { %2816 = vmatmul.mubr.msk.f32.vlgmr.msra.gmra.mxu0 %vm430_vm0, %v3165_v10  ;;  %2829 = vmatprep.subr.mxu0 %v3008_v2 }
  0x50   : > { %2831 = vmatprep.mubr.msk.f32.mxu0 %vm3009_vm1, %v3008_v2  ;;  %2820 = vmatprep.subr.mxu1 %v3008_v2 }
  0x51   : > { %2821 = vmatpush3.msra.mxu1 %v2584_v49 }
  0x52   : > { %2822 = vmatprep.subr.mxu1 %v3008_v2 }
  0x53   : > { %2823 = vmatpush3.msra.mxu1 %v2583_v50 }
  0x54   : > { %2824 = vmatprep.subr.mxu1 %v3008_v2 }
  0x55   : > { %2825 = vmatpush3.msra.mxu1 %v2582_v51 }
  0x56   : > { %2827 = vmatmul.mubr.msk.f32.vlgmr.msra.gmra.mxu1 %vm430_vm0, %v3209_v19  ;;  %2834 = vmatprep.subr.mxu1 %v3008_v2 }
  0x57   : > { %2836 = vmatprep.mubr.msk.f32.mxu1 %vm3009_vm1, %v3008_v2 }
  0xe0   : > { %v500_v54 = vpop.f32.mrf.mxu0  ;;  %v586_v55 = vpop.f32.mrf.mxu1 }
  0xe1   : > { %v501_v56 = vadd.f32 %v2520_v52, %v500_v54  ;;  %v587_v57 = vadd.f32 %v2522_v53, %v586_v55 }
  0xe2   : > { %v2707_v58 = vpop.f32.mrf.mxu0  ;;  %v2718_v59 = vpop.f32.mrf.mxu1 }
  0xe3   : > { %505 = vst.msk [vmem:[#allocation2] sm:$0xff] %vm504_vm2, %v501_v56  ;;  %590 = vst.msk [vmem:[#allocation3] sm:$0xff] %vm504_vm2, %v587_v57 }
  0xe9   : > { %v671_v61 = vpop.f32.mrf.mxu0 }
  0xea   : > { %v672_v63 = vadd.f32 %v2524_v60, %v671_v61  ;;  %v1445_v0 = vld [vmem:[#allocation3] sm:$0xff] }
  0xeb   : > { %v2729_v1 = vpop.f32.mrf.mxu0  ;;  %2830 = vmatpush3.xpose.msk.msra.mxu0 %vm504_vm2, %v1445_v0  ;;  %v755_v3 = vpop.f32.mrf.mxu1  ;;  %v1441_v5 = vld [vmem:[#allocation2] sm:$0xff] }
  0xec   : > { %675 = vst.msk [vmem:[#allocation4] sm:$0xff] %vm504_vm2, %v672_v63  ;;  %v756_v4 = vadd.f32 %v2531_v62, %v755_v3  ;;  %2839 = vmatprep.subr.mxu0 %v3008_v2 }
  0xed   : > { %v2740_v6 = vpop.f32.mrf.mxu1 }
  0xee   : > { %2832 = vmatmul.mubr.msk.f32.vlgmr.msra.gmra.mxu0 %vm504_vm2, %v1441_v5  ;;  %760 = vst.msk [vmem:[#allocation2 + $0x8] sm:$0xff] %vm504_vm2, %v756_v4 }
  0xef   : > { %2841 = vmatprep.mubr.msk.f32.mxu0 %vm3009_vm1, %v3008_v2 }
  0xf3   : > { %v840_v8 = vpop.f32.mrf.mxu0  ;;  %v1809_v33 = vld [vmem:[#allocation4] sm:$0xff] }
  0xf4   : > { %v841_v10 = vadd.f32 %v2538_v7, %v840_v8 }
  0xf5   : > { %v2751_v11 = vpop.f32.mrf.mxu0  ;;  %v925_v12 = vpop.f32.mrf.mxu1  ;;  %v1442_v20 = vld [vmem:[#allocation2 + $0x8] sm:$0xff] }
  0xf6   : > { %845 = vst.msk [vmem:[#allocation3 + $0x8] sm:$0xff] %vm504_vm2, %v841_v10  ;;  %v926_v13 = vadd.f32 %v2545_v9, %v925_v12 }
  0xf7   : > { %v2762_v14 = vpop.f32.mrf.mxu1 }
  0xf8   : > { %930 = vst.msk [vmem:[#allocation4 + $0x8] sm:$0xff] %vm504_vm2, %v926_v13 }
  0xfd   : > { %v1446_v17 = vld [vmem:[#allocation3 + $0x8] sm:$0xff] }
  0xfe   : > { %v1010_v18 = vpop.f32.mrf.mxu0  ;;  %v1095_v19 = vpop.f32.mrf.mxu1  ;;  %2835 = vmatpush3.xpose.msk.msra.mxu1 %vm504_vm2, %v1446_v17 }
  0xff   : > { %v1011_v21 = vadd.f32 %v2552_v15, %v1010_v18  ;;  %v1096_v22 = vadd.f32 %v2559_v16, %v1095_v19  ;;  %2844 = vmatprep.subr.mxu1 %v3008_v2  ;;  %v1810_v42 = vld [vmem:[#allocation4 + $0x8] sm:$0xff] }
 0x100   : > { %v2773_v23 = vpop.f32.mrf.mxu0  ;;  %v2784_v24 = vpop.f32.mrf.mxu1 }
 0x101   : > { %1015 = vst.msk [vmem:[#allocation2 + $0x10] sm:$0xff] %vm504_vm2, %v1011_v21  ;;  %1100 = vst.msk [vmem:[#allocation3 + $0x10] sm:$0xff] %vm504_vm2, %v1096_v22  ;;  %2837 = vmatmul.mubr.msk.f32.vlgmr.msra.gmra.mxu1 %vm504_vm2, %v1442_v20 }
 0x102   : > { %2846 = vmatprep.mubr.msk.f32.mxu1 %vm3009_vm1, %v3008_v2 }
 0x107   : > { %v1180_v26 = vpop.f32.mrf.mxu0 }
 0x108   : > { %v1181_v27 = vadd.f32 %v2566_v25, %v1180_v26  ;;  %v1447_v28 = vld [vmem:[#allocation3 + $0x10] sm:$0xff] }
 0x109   : > { %v2795_v29 = vpop.f32.mrf.mxu0  ;;  %2840 = vmatpush3.xpose.msk.msra.mxu0 %vm504_vm2, %v1447_v28  ;;  %v1443_v31 = vld [vmem:[#allocation2 + $0x10] sm:$0xff] }
 0x10a   : > { %1185 = vst.msk [vmem:[#allocation4 + $0x10] sm:$0xff] %vm504_vm2, %v1181_v27  ;;  %2849 = vmatprep.subr.mxu0 %v3008_v2 }
 0x10b   : > { %v1265_v32 = vpop.f32.mrf.mxu1 }
 0x10c   : > { %2842 = vmatmul.mubr.msk.f32.vlgmr.msra.gmra.mxu0 %vm504_vm2, %v1443_v31  ;;  %v1266_v34 = vadd.f32 %v2573_v30, %v1265_v32 }
 0x10d   : > { %2850 = vmatpush3.msra.mxu0 %v1809_v33  ;;  %v2806_v36 = vpop.f32.mrf.mxu1  ;;  %2851 = vmatprep.mubr.msk.f32.mxu0 %vm3009_vm1, %v3008_v2 }
 0x10e   : > { %1270 = vst.msk [vmem:[#allocation2 + $0x18] sm:$0xff] %vm504_vm2, %v1266_v34  ;;  %2859 = vmatprep.subr.mxu0 %v3008_v2 }
 0x10f   : > { %v1350_v37 = vpop.f32.mrf.mxu0 }
 0x110   : > { %v1351_v38 = vadd.f32 %v2580_v35, %v1350_v37 }
 0x111   : > { %v2817_v39 = vpop.f32.mrf.mxu0  ;;  %v1811_v23 = vld [vmem:[#allocation4 + $0x10] sm:$0xff] }
 0x112   : > { %1355 = vst.msk [vmem:[#allocation3 + $0x18] sm:$0xff] %vm504_vm2, %v1351_v38 }
 0x115   : > { %v1444_v41 = vld [vmem:[#allocation2 + $0x18] sm:$0xff] }
 0x116   : > { %v1435_v44 = vpop.f32.mrf.mxu1 }
 0x117   : > { %v1436_v45 = vadd.f32 %v2587_v43, %v1435_v44  ;;  %v2601_v43 = vld [vmem:[%s3548_s9 + $0x8] sm:$0xff]  ;;  %v2606_v44 = vld [vmem:[%s3548_s9 + $0x18] sm:$0xff] }
 0x118   : > { %v2828_v46 = vpop.f32.mrf.mxu1 }
 0x119   : > { %v1448_v40 = vld [vmem:[#allocation3 + $0x18] sm:$0xff]  ;;  %1440 = vst.msk [vmem:[#allocation4 + $0x18] sm:$0xff] %vm504_vm2, %v1436_v45 }
 0x11a   : > { %2845 = vmatpush3.xpose.msk.msra.mxu1 %vm504_vm2, %v1448_v40 }
 0x11b   : > { %2854 = vmatprep.subr.mxu1 %v3008_v2 }
 0x11d   : > { %2847 = vmatmul.mubr.msk.f32.vlgmr.msra.gmra.mxu1 %vm504_vm2, %v1444_v41 }
 0x11e   : > { %2855 = vmatpush3.msra.mxu1 %v1810_v42  ;;  %2856 = vmatprep.mubr.msk.f32.mxu1 %vm3009_vm1, %v3008_v2  ;;  %v2105_v42 = vld [vmem:[%s3548_s9] sm:$0xff] }
 0x11f   : > { %2864 = vmatprep.subr.mxu1 %v3008_v2 }
 0x120   : > { %v1812_v30 = vld [vmem:[#allocation4 + $0x18] sm:$0xff] }
 0x1ae   : > { %v1521_v47 = vpop.f32.mrf.mxu0 }
 0x1af   : > { %v1753_v48 = vsel %vm504_vm2, %v1521_v47, -inf }
 0x1b0   : > { %1754 = vmax.xlane.f32.xlu0 %v1753_v48  ;;  %v2833_v49 = vpop.f32.mrf.mxu0 }
 0x1c1   : > { %v1597_v50 = vpop.f32.mrf.mxu1 }
 0x1c2   : > { %v1756_v51 = vsel %vm504_vm2, %v1597_v50, -inf }
 0x1c3   : > { %v2838_v52 = vpop.f32.mrf.mxu1  ;;  %1757 = vmax.xlane.f32.xlu0 %v1756_v51 }
 0x1cc   : > { %v1673_v53 = vpop.f32.mrf.mxu0 }
 0x1cd   : > { %v1759_v54 = vsel %vm504_vm2, %v1673_v53, -inf }
 0x1ce   : > { %1760 = vmax.xlane.f32.xlu1 %v1759_v54  ;;  %v2843_v55 = vpop.f32.mrf.mxu0 }
 0x1dd   : > { %v1749_v56 = vpop.f32.mrf.mxu1 }
 0x1de   : > { %v1762_v57 = vsel %vm504_vm2, %v1749_v56, -inf }
 0x1df   : > { %v2848_v58 = vpop.f32.mrf.mxu1  ;;  %1763 = vmax.xlane.f32.xlu1 %v1762_v57 }
 0x239   : > { %v1755_v59 = vpop.xlane.xlu0 %1754 }
 0x23a   : > { %v1765_v60 = vsub.f32 %v1521_v47, %v1755_v59  ;;  %v2604_v47 = vld [vmem:[%s3548_s9 + $0x10] sm:$0xff] }
 0x23c   : > { %v1769_v61 = vmul.f32 1.442695, %v1765_v60 }
 0x23e   : > { %2930 = vpow2.f32 %v1769_v61 }
 0x24b   : > { %v2931_v62 = vpop.eup %2930 }
 0x24c   : > { %v1758_v63 = vpop.xlane.xlu0 %1757  ;;  %v1777_v0 = vsel %vm504_vm2, %v2931_v62, 0.0 }
 0x24d   : > { %v1766_v1 = vsub.f32 %v1597_v50, %v1758_v63  ;;  %1778 = vadd.xlane.f32.xlu0 %v1777_v0 }
 0x24f   : > { %v1771_v3 = vmul.f32 1.442695, %v1766_v1 }
 0x251   : > { %2932 = vpow2.f32 %v1771_v3 }
 0x257   : > { %v1761_v4 = vpop.xlane.xlu1 %1760 }
 0x258   : > { %v1767_v5 = vsub.f32 %v1673_v53, %v1761_v4 }
 0x25a   : > { %v1773_v6 = vmul.f32 1.442695, %v1767_v5 }
 0x25c   : > { %2934 = vpow2.f32 %v1773_v6 }
 0x25e   : > { %v2933_v7 = vpop.eup %2932 }
 0x25f   : > { %v1780_v8 = vsel %vm504_vm2, %v2933_v7, 0.0 }
 0x260   : > { %1781 = vadd.xlane.f32.xlu1 %v1780_v8 }
 0x268   : > { %v1764_v9 = vpop.xlane.xlu1 %1763 }
 0x269   : > { %v2935_v10 = vpop.eup %2934  ;;  %v1768_v11 = vsub.f32 %v1749_v56, %v1764_v9 }
 0x26a   : > { %v1783_v12 = vsel %vm504_vm2, %v2935_v10, 0.0 }
 0x26b   : > { %v1775_v13 = vmul.f32 1.442695, %v1768_v11  ;;  %1784 = vadd.xlane.f32.xlu0 %v1783_v12 }
 0x26d   : > { %2936 = vpow2.f32 %v1775_v13 }
 0x27a   : > { %v2937_v14 = vpop.eup %2936 }
 0x27b   : > { %v1786_v15 = vsel %vm504_vm2, %v2937_v14, 0.0 }
 0x27c   : > { %1787 = vadd.xlane.f32.xlu1 %v1786_v15 }
 0x2d6   : > { %v1779_v16 = vpop.xlane.xlu0 %1778 }
 0x2d7   : > { %2938 = vrcp.f32 %v1779_v16 }
 0x2e4   : > { %v2939_v17 = vpop.eup %2938 }
 0x2e5   : > { %v1793_v18 = vmul.f32 %v2939_v17, %v1779_v16 }
 0x2e7   : > { %v1797_v19 = vsub.f32 2.0, %v1793_v18 }
 0x2e9   : > { %v1801_v20 = vmul.f32 %v2939_v17, %v1797_v19  ;;  %v1782_v21 = vpop.xlane.xlu1 %1781 }
 0x2ea   : > { %2940 = vrcp.f32 %v1782_v21 }
 0x2eb   : > { %v1805_v22 = vmul.f32 %v2931_v62, %v1801_v20  ;;  %v2608_v62 = vld [vmem:[%s3549_s10] ss:$0 sm:$0xff] }
 0x2ed   : > { %2852 = vmatmul.mubr.msk.f32.vlgmr.msra.gmra.mxu0 %vm504_vm2, %v1805_v22 }
 0x2ee   : > { %2860 = vmatpush3.msra.mxu0 %v1811_v23  ;;  %2861 = vmatprep.mubr.msk.f32.mxu0 %vm3009_vm1, %v3008_v2 }
 0x2ef   : > { %2869 = vmatprep.subr.mxu0 %v3008_v2 }
 0x2f4   : > { %v1785_v24 = vpop.xlane.xlu0 %1784 }
 0x2f5   : > { %2942 = vrcp.f32 %v1785_v24 }
 0x2f7   : > { %v2941_v25 = vpop.eup %2940 }
 0x2f8   : > { %v1794_v26 = vmul.f32 %v2941_v25, %v1782_v21 }
 0x2fa   : > { %v1798_v27 = vsub.f32 2.0, %v1794_v26 }
 0x2fc   : > { %v1802_v28 = vmul.f32 %v2941_v25, %v1798_v27 }
 0x2fe   : > { %v1806_v29 = vmul.f32 %v2933_v7, %v1802_v28 }
 0x300   : > { %2857 = vmatmul.mubr.msk.f32.vlgmr.msra.gmra.mxu1 %vm504_vm2, %v1806_v29 }
 0x301   : > { %2865 = vmatpush3.msra.mxu1 %v1812_v30  ;;  %2866 = vmatprep.mubr.msk.f32.mxu1 %vm3009_vm1, %v3008_v2 }
 0x302   : > { %v2943_v31 = vpop.eup %2942  ;;  %2874 = vmatprep.subr.mxu1 %v3008_v2 }
 0x303   : > { %v1795_v32 = vmul.f32 %v2943_v31, %v1785_v24 }
 0x305   : > { %v1799_v33 = vsub.f32 2.0, %v1795_v32  ;;  %v1788_v34 = vpop.xlane.xlu1 %1787 }
 0x306   : > { %2944 = vrcp.f32 %v1788_v34 }
 0x307   : > { %v1803_v35 = vmul.f32 %v2943_v31, %v1799_v33 }
 0x309   : > { %v1807_v36 = vmul.f32 %v2935_v10, %v1803_v35 }
 0x30b   : > { %2862 = vmatmul.mubr.msk.f32.vlgmr.msra.gmra.mxu0 %vm504_vm2, %v1807_v36 }
 0x30c   : > { %2871 = vmatprep.mubr.msk.f32.mxu0 %vm3009_vm1, %v3008_v2  ;;  %2870 = vmatpush3.msra.mxu0 %v2601_v43 }
 0x30d   : > { %2879 = vmatprep.subr.mxu0 %v3008_v2 }
 0x313   : > { %v2945_v37 = vpop.eup %2944 }
 0x314   : > { %v1796_v38 = vmul.f32 %v2945_v37, %v1788_v34 }
 0x316   : > { %v1800_v39 = vsub.f32 2.0, %v1796_v38 }
 0x318   : > { %v1804_v40 = vmul.f32 %v2945_v37, %v1800_v39 }
 0x31a   : > { %v1808_v41 = vmul.f32 %v2937_v14, %v1804_v40 }
 0x31c   : > { %2867 = vmatmul.mubr.msk.f32.vlgmr.msra.gmra.mxu1 %vm504_vm2, %v1808_v41 }
 0x31d   : > { %2876 = vmatprep.mubr.msk.f32.mxu1 %vm3009_vm1, %v3008_v2  ;;  %2875 = vmatpush3.msra.mxu1 %v2105_v42 }
 0x31e   : > { %2884 = vmatprep.subr.mxu1 %v3008_v2 }
 0x3ad   : > { %v1882_v45 = vpop.f32.mrf.mxu0 }
 0x3ae   : > { %2877 = vmatmul.mubr.msk.f32.vlgmr.msra.gmra.mxu1 %vm504_vm2, %v1882_v45 }
 0x3af   : > { %v2853_v46 = vpop.f32.mrf.mxu0  ;;  %2885 = vmatpush3.msra.mxu1 %v2606_v44  ;;  %2886 = vmatprep.mubr.msk.f32.mxu1 %vm3009_vm1, %v3008_v2 }
 0x3c0   : > { %v1955_v48 = vpop.f32.mrf.mxu1 }
 0x3c1   : > { %2872 = vmatmul.mubr.msk.f32.vlgmr.msra.gmra.mxu0 %vm504_vm2, %v1955_v48 }
 0x3c2   : > { %v2858_v49 = vpop.f32.mrf.mxu1  ;;  %2880 = vmatpush3.msra.mxu0 %v2604_v47  ;;  %2881 = vmatprep.mubr.msk.f32.mxu0 %vm3009_vm1, %v3008_v2 }
 0x3cb   : > { %v2028_v50 = vpop.f32.mrf.mxu0 }
 0x3cc   : > { %2882 = vmatmul.mubr.msk.f32.vlgmr.msra.gmra.mxu0 %vm504_vm2, %v2028_v50 }
 0x3cd   : > { %v2863_v51 = vpop.f32.mrf.mxu0 }
 0x3dc   : > { %v2101_v52 = vpop.f32.mrf.mxu1 }
 0x3dd   : > { %2887 = vmatmul.mubr.msk.f32.vlgmr.msra.gmra.mxu1 %vm504_vm2, %v2101_v52 }
 0x3de   : > { %v2868_v53 = vpop.f32.mrf.mxu1 }
 0x46e   : > { %v2250_v54 = vpop.f32.mrf.mxu1 }
 0x470   : > { %v2878_v55 = vpop.f32.mrf.mxu1 }
 0x481   : > { %v2177_v56 = vpop.f32.mrf.mxu0 }
 0x482   : > { %v2251_v60 = vadd.f32 %v2250_v54, %v2177_v56 }
 0x483   : > { %v2873_v57 = vpop.f32.mrf.mxu0 }
 0x48c   : > { %v2325_v58 = vpop.f32.mrf.mxu0 }
 0x48d   : > { %v2329_v2 = vadd.f32 %v2325_v58, %v2251_v60 }
 0x48e   : > { %v2883_v59 = vpop.f32.mrf.mxu0 }
 0x49d   : > { %v2401_v61 = vpop.f32.mrf.mxu1 }
 0x49e   : > { %v2405_v63 = vadd.f32 %v2401_v61, %v2329_v2 }
 0x49f   : > { %v2888_v0 = vpop.f32.mrf.mxu1 }
 0x4a0   : > { %v2413_v1 = vadd.f32 %v2608_v62, %v2405_v63 }
 0x4a2   : > { %2414 = vst.msk [vmem:[%s403_s26] sm:$0xff] %vm430_vm0, %v2413_v1 }
 0x4a3   : > { %2959 = shalt.err (!%p2956_p3)
}
 0x4a4   : > { %s2960_s13 = scalar_lea.hbm %s2427_s22, 128  ;;  %s2964_s26 = scalar_lea.hbm %s3550_s11, 256 }
 0x4a5   : > { %p2961_p4 = scmp.ne.s32.totalorder %s2427_s22, %s2960_s13  ;;  %p2965_p9 = scmp.lt.s32.totalorder %s2427_s22, %s3550_s11 }
 0x4a6   : > { %p2966_p10 = scmp.lt.s32.totalorder %s2964_s26, %s2960_s13 }
 0x4a7   : > { %p2962_p7 = pnand %p2961_p4, %p3109_p5 }
 0x4a8   : > { %p2967_p11 = por %p2966_p10, %p2965_p9 }
 0x4a9   : > { %p2963_p8 = pneg %p2962_p7 }
 0x4ab   : > { %p2968_p12 = pnand %p2967_p11, %p2963_p8 }
 0x4ad   : > { %2971 = shalt.err (!%p2968_p12)
}
 0x4ae   : > { %2889 = dma.vmem_to_hbm [thread:$0]  (%p3109_p5), %s2430_s14, 128, %s2427_s22, %s2416_s25  }
 0x4af PF: > { %p2895_p13 = scmp.ge.s32.totalorder %s3006_s20, 2  ;;  %s2441_s0 = sand.u32 1, %s2994_s17  }
 0x4b0   : > { %s2442_s12 = scalar_lea.sflag [#allocation6], %s2441_s0 }
 0x4b1   : > { %p2892_p0 = pnand %p2895_p13, %p3113_p6 }
 0x4b3   : > { %p2893_p1 = pneg %p2892_p0 }
 0x4b5   : > { %2989 = dma.done.wait (%p2893_p1), %s2442_s12, 128  }
 0x4b6   : > { %2991 = vsyncadd (%p2893_p1), %s2442_s12, 4294967168  ;;  %s3556_s21 = sld [smem:[#allocation8_spill]]  ;;  %p21_p2 = scmp.ge.s32.totalorder %s3096_s23, 4  }
 0x4b7   : > { %s3557_s17 = smov %s2998_s18  ;;  %s3558_s18 = smov %s3002_s19 }
 0x4b8   : > { %s3560_s20 = smov %s3096_s23  ;;  %23 = sbr.rel (!%p21_p2) target bundleno = 5 (0x5), region = 135 }
 0x4bc   : > { %s3559_s19 = smov %s3556_s21 }
 0x4bd   :  { %2447 = vsyncpa [#allocation6], 1 }
 0x4be   :  { %2449 = vsyncpa [#allocation6 + $0x1], 1 }

</bundles_post_ra>
